<compile_context>
chip_gen: v7x
topology: tpu7x:2x2x1
jax: 0.10.0
libtpu: 0.0.40
codegen_flags: <defaults>
</compile_context>

<pallas_src>
import functools
import math

import jax
import jax.numpy as jnp
from jax.experimental import pallas as pl
from jax.experimental.pallas import tpu as pltpu

LANE = 128


def _round_up(v, m):
    return (v + m - 1) // m * m


def _pad2(arr, rows, cols=None):
    pr = rows - arr.shape[0]
    pc = 0 if cols is None else cols - arr.shape[1]
    if pr == 0 and pc == 0:
        return arr
    return jnp.pad(arr, ((0, pr), (0, pc)))


def _sage_layer_kernel(a_ref, x_ref, wl_ref, wr_ref, b_ref, o_ref,
                       acc_ref, deg_ref, self_ref, *, relu, tile_m, tile_k):
    """One SAGEConv layer block-row: tiled mean-agg + split linear epilogue.

    a_ref:  (tile_m, tile_k) bf16   adjacency tile (row i's in-neighbors)
    x_ref:  (n_pad, f_in)    bf16   VMEM-resident node features
    wl_ref: (f_in, f_out)    f32    neighbor weight W_l
    wr_ref: (f_in, f_out)    f32    self weight W_r
    b_ref:  (1, f_out)       f32    bias
    """
    i = pl.program_id(0)
    k = pl.program_id(1)

    @pl.when(k == 0)
    def _():
        acc_ref[...] = jnp.zeros_like(acc_ref)
        deg_ref[...] = jnp.zeros_like(deg_ref)
        # Self term x_i @ W_r once per row block, off the (heavy) last step.
        row0 = pl.multiple_of(i * tile_m, tile_m)
        xs = x_ref[pl.ds(row0, tile_m), :]
        self_ref[...] = jnp.dot(xs, wr_ref[...],
                                preferred_element_type=jnp.float32)

    # Aggregation matmul on the MXU: bf16 operands, f32 accumulation.
    a = a_ref[...]
    col0 = pl.multiple_of(k * tile_k, tile_k)
    xn = x_ref[pl.ds(col0, tile_k), :]
    acc_ref[...] += jnp.dot(a, xn, preferred_element_type=jnp.float32)
    # Degree rides on tiles already in VMEM (VPU/XLU filler in a DMA-bound loop).
    deg_ref[...] += jnp.sum(a.astype(jnp.float32), axis=-1, keepdims=True)

    @pl.when(k == pl.num_programs(1) - 1)
    def _():
        deg = deg_ref[...]
        inv_deg = jnp.where(deg > 0.0, 1.0 / deg, 0.0)      # exact f32 mean norm
        agg = acc_ref[...] * inv_deg                          # [TM, F_in]
        out = (jnp.dot(agg, wl_ref[...], preferred_element_type=jnp.float32)
               + self_ref[...] + b_ref[...])
        if relu:
            out = jnp.maximum(out, 0.0)
        o_ref[...] = out.astype(o_ref.dtype)


def _vmem_limit_bytes(n_pad, f_in, f_out, tile_m, tile_k):
    est = (2 * tile_m * tile_k * 2        # A tiles (double-buffered, bf16)
           + 2 * n_pad * f_in * 2         # resident X (bf16)
           + 2 * 2 * f_in * f_out * 4     # W_l, W_r
           + 2 * 8 * f_out * 4            # bias
           + 2 * tile_m * f_out * 4       # out tile
           + tile_m * f_in * 4            # acc scratch
           + tile_m * LANE * 4            # deg scratch (lane-padded)
           + tile_m * f_out * 4)          # self-term scratch
    # v7x has only 64 MiB physical VMEM -> clamp the budget there.
    return int(min(max(2 * est, 32 * 1024 * 1024), 64 * 1024 * 1024))


def sage_conv(a_bf16, x_bf16, w_l, w_r, b, *, relu, out_dtype,
              tile_m, tile_k):
    """One fused SAGEConv layer.

    a_bf16: [N_pad, N_pad]  bf16 dense 0/1 adjacency (row i = in-neighbors of i)
    x_bf16: [N_pad, F_in]   bf16 node features, VMEM-resident inside the kernel
    w_l:    [F_in, F_out]   f32 neighbor weight
    w_r:    [F_in, F_out]   f32 self weight
    b:      [1, F_out]      f32 bias
    """
    n_pad = a_bf16.shape[0]
    f_in = x_bf16.shape[1]
    f_out = w_l.shape[1]
    grid = (n_pad // tile_m, n_pad // tile_k)

    return pl.pallas_call(
        functools.partial(_sage_layer_kernel, relu=relu,
                          tile_m=tile_m, tile_k=tile_k),
        out_shape=jax.ShapeDtypeStruct((n_pad, f_out), out_dtype),
        grid_spec=pltpu.PrefetchScalarGridSpec(
            num_scalar_prefetch=0,
            grid=grid,
            in_specs=[
                pl.BlockSpec((tile_m, tile_k), lambda i, k: (i, k)),   # A tile
                pl.BlockSpec((n_pad, f_in), lambda i, k: (0, 0)),      # X (resident)
                pl.BlockSpec((f_in, f_out), lambda i, k: (0, 0)),      # W_l
                pl.BlockSpec((f_in, f_out), lambda i, k: (0, 0)),      # W_r
                pl.BlockSpec((1, f_out), lambda i, k: (0, 0)),         # bias
            ],
            out_specs=pl.BlockSpec((tile_m, f_out), lambda i, k: (i, 0)),
            scratch_shapes=[
                pltpu.VMEM((tile_m, f_in), jnp.float32),   # A @ X accumulator
                pltpu.VMEM((tile_m, 1), jnp.float32),      # degree accumulator
                pltpu.VMEM((tile_m, f_out), jnp.float32),  # self-term x_i @ W_r
            ],
        ),
        compiler_params=pltpu.CompilerParams(
            dimension_semantics=("parallel", "arbitrary"),
            vmem_limit_bytes=_vmem_limit_bytes(n_pad, f_in, f_out,
                                               tile_m, tile_k),
        ),
    )(a_bf16, x_bf16, w_l, w_r, b)


def _choose_tiles(n, tile_m, tile_k):
    """Clamp tiles to the problem and keep >=2 row blocks (v7x megacore)."""
    n128 = _round_up(n, LANE)
    tile_m = min(tile_m, n128)
    tile_k = min(tile_k, n128)
    if n128 // tile_m < 2 and tile_m > LANE:
        tile_m = max(LANE, (n128 // 2) // LANE * LANE)
    n_pad = _round_up(n, math.lcm(tile_m, tile_k))
    return n_pad, tile_m, tile_k


def graphsage2_forward(x, adj, params, dropout_p=0.5, training=False,
                       *, tile_m=512, tile_k=512):
    """Equivalent of GraphSAGE2.forward (inference mode)."""
    del dropout_p, training  # eval mode: F.dropout is identity
    n = x.shape[0]
    f_in1 = params["w1_l"].shape[0]
    n_pad, tile_m, tile_k = _choose_tiles(n, tile_m, tile_k)

    # bf16 adjacency / features: 0/1 exact in bf16; halves HBM bytes.
    # TODO(synk): for very large N (resident X > ~48 MiB) fall back to streamed
    # X tiles instead of the VMEM-resident block.
    a_bf = _pad2(adj.astype(jnp.float32), n_pad, n_pad).astype(jnp.bfloat16)
    x_bf = _pad2(x.astype(jnp.float32), n_pad, f_in1).astype(jnp.bfloat16)

    # Layer 1 emits bf16 directly: layer 2's neighbor stream needs no cast.
    h = sage_conv(a_bf, x_bf, params["w1_l"], params["w1_r"], params["b1"],
                  relu=True, out_dtype=jnp.bfloat16,
                  tile_m=tile_m, tile_k=tile_k)
    out = sage_conv(a_bf, h, params["w2_l"], params["w2_r"], params["b2"],
                    relu=False, out_dtype=jnp.float32,
                    tile_m=tile_m, tile_k=tile_k)
    return out[:n, :params["nclass"]]


def init_params(key, nfeat, nhid, nclass):
    """Glorot-uniform weights, zero-padded to lane width; W_l / W_r kept split."""
    k1, k2, k3, k4 = jax.random.split(key, 4)

    def glorot(k, fan_in, fan_out, pad_in, pad_out):
        lim = (6.0 / (fan_in + fan_out)) ** 0.5
        w = jax.random.uniform(k, (fan_in, fan_out), jnp.float32,
                               minval=-lim, maxval=lim)
        return jnp.pad(w, ((0, pad_in - fan_in), (0, pad_out - fan_out)))

    f_in1, f_out1 = _round_up(nfeat, LANE), _round_up(nhid, LANE)
    f_in2, f_out2 = _round_up(nhid, LANE), _round_up(nclass, LANE)

    return {
        "w1_l": glorot(k1, nfeat, nhid, f_in1, f_out1),
        "w1_r": glorot(k2, nfeat, nhid, f_in1, f_out1),
        "b1": jnp.zeros((1, f_out1), jnp.float32),
        "w2_l": glorot(k3, nhid, nclass, f_in2, f_out2),
        "w2_r": glorot(k4, nhid, nclass, f_in2, f_out2),
        "b2": jnp.zeros((1, f_out2), jnp.float32),
        "nfeat": nfeat, "nhid": nhid, "nclass": nclass,
    }


if __name__ == "__main__":
    key = jax.random.PRNGKey(0)
    k_x, k_adj, k_p = jax.random.split(key, 3)

    N, NFEAT, NHID, NCLASS = 256, 32, 64, 16

    # node features [N, NFEAT]
    x = jax.random.normal(k_x, (N, NFEAT), jnp.float32)

    # random sparse symmetric adjacency (dense 0/1 matrix), no self loops
    probs = jax.random.uniform(k_adj, (N, N))
    adj = (probs < 0.05).astype(jnp.float32)
    adj = jnp.maximum(adj, adj.T)
    adj = adj * (1.0 - jnp.eye(N, dtype=jnp.float32))

    params = init_params(k_p, NFEAT, NHID, NCLASS)

    out = graphsage2_forward(x, adj, params, dropout_p=0.5, training=False)
    out = jax.block_until_ready(out)
    assert out.shape == (N, NCLASS), out.shape
    assert bool(jnp.all(jnp.isfinite(out)))

    # pure-JAX reference, matching the kernel's precision path
    # (bf16 adjacency & features for aggregation, bf16 inter-layer h, f32 norm).
    f_in1 = _round_up(NFEAT, LANE)
    a_bf = adj.astype(jnp.bfloat16)
    deg = adj.sum(-1, keepdims=True)
    inv_deg = jnp.where(deg > 0, 1.0 / deg, 0.0)

    def ref_layer(x_bf, w_l, w_r, b, relu):
        agg = jnp.dot(a_bf, x_bf, preferred_element_type=jnp.float32) * inv_deg
        out = (jnp.dot(agg, w_l, preferred_element_type=jnp.float32)
               + jnp.dot(x_bf.astype(jnp.float32), w_r,
                         preferred_element_type=jnp.float32) + b)
        return jnp.maximum(out, 0.0) if relu else out

    x_bf = jnp.pad(x, ((0, 0), (0, f_in1 - NFEAT))).astype(jnp.bfloat16)
    h_ref = ref_layer(x_bf, params["w1_l"], params["w1_r"], params["b1"],
                      True).astype(jnp.bfloat16)
    o_ref = ref_layer(h_ref, params["w2_l"], params["w2_r"], params["b2"],
                      False)
    ref = o_ref[:, :NCLASS]
    assert bool(jnp.allclose(out, ref, atol=1e-2, rtol=1e-2))

    print("KERNEL_OK")
</pallas_src>

<mosaic_0001>
module attributes {stable_mosaic.version = 11 : i64} {
  func.func @_sage_layer_kernel(%arg0: i32, %arg1: i32, %arg2: memref<128x256xbf16, #tpu.memory_space<vmem>>, %arg3: memref<256x128xbf16, #tpu.memory_space<vmem>>, %arg4: memref<128x128xf32, #tpu.memory_space<vmem>>, %arg5: memref<128x128xf32, #tpu.memory_space<vmem>>, %arg6: memref<1x128xf32, #tpu.memory_space<vmem>>, %arg7: memref<128x128xbf16, #tpu.memory_space<vmem>>, %arg8: memref<128x128xf32, #tpu.memory_space<vmem>>, %arg9: memref<128x1xf32, #tpu.memory_space<vmem>>, %arg10: memref<128x128xf32, #tpu.memory_space<vmem>>) attributes {dimension_semantics = [#tpu.dimension_semantics<parallel>, #tpu.dimension_semantics<arbitrary>], iteration_bounds = array<i64: 2, 1>, scalar_prefetch = 0 : i64, scratch_operands = 3 : i64, tpu.core_type = #tpu.core_type<tc>, window_params = [{transform_indices = @transform_0, window_bounds = array<i64: 128, 256>}, {pipeline_mode = #tpu.pipeline_mode<synchronous>, transform_indices = @transform_1, window_bounds = array<i64: 256, 128>}, {pipeline_mode = #tpu.pipeline_mode<synchronous>, transform_indices = @transform_2, window_bounds = array<i64: 128, 128>}, {pipeline_mode = #tpu.pipeline_mode<synchronous>, transform_indices = @transform_3, window_bounds = array<i64: 128, 128>}, {pipeline_mode = #tpu.pipeline_mode<synchronous>, transform_indices = @transform_4, window_bounds = array<i64: 1, 128>}, {transform_indices = @transform_5, window_bounds = array<i64: 128, 128>}]} {
    %c0_i32 = arith.constant 0 : i32
    %0 = arith.cmpi eq, %arg1, %c0_i32 : i32
    %1 = arith.extui %0 : i1 to i32
    %c0_i32_0 = arith.constant 0 : i32
    %2 = arith.cmpi ne, %1, %c0_i32_0 : i32
    scf.if %2 {
      %cst_14 = arith.constant 0.000000e+00 : f32
      %21 = vector.broadcast %cst_14 : f32 to vector<128x128xf32>
      %c0_15 = arith.constant 0 : index
      %c0_16 = arith.constant 0 : index
      %22 = vector.load %arg8[%c0_15, %c0_16] : memref<128x128xf32, #tpu.memory_space<vmem>>, vector<128x128xf32>
      tpu.vector_store %arg8[%c0_15, %c0_16], %21 {strides = array<i32>} : memref<128x128xf32, #tpu.memory_space<vmem>>, vector<128x128xf32>,
      %cst_17 = arith.constant 0.000000e+00 : f32
      %23 = vector.broadcast %cst_17 : f32 to vector<128x1xf32>
      %c0_18 = arith.constant 0 : index
      %c0_19 = arith.constant 0 : index
      %24 = vector.load %arg9[%c0_18, %c0_19] : memref<128x1xf32, #tpu.memory_space<vmem>>, vector<128x1xf32>
      tpu.vector_store %arg9[%c0_18, %c0_19], %23 {strides = array<i32>} : memref<128x1xf32, #tpu.memory_space<vmem>>, vector<128x1xf32>,
      %c128_i32 = arith.constant 128 : i32
      %25 = arith.muli %arg0, %c128_i32 : i32
      %26 = tpu.assume_multiple %25, 128 : i32
      %27 = arith.index_cast %26 : i32 to index
      %c0_20 = arith.constant 0 : index
      %28 = vector.load %arg3[%27, %c0_20] : memref<256x128xbf16, #tpu.memory_space<vmem>>, vector<128x128xbf16>
      %c0_21 = arith.constant 0 : index
      %c0_22 = arith.constant 0 : index
      %29 = vector.load %arg5[%c0_21, %c0_22] : memref<128x128xf32, #tpu.memory_space<vmem>>, vector<128x128xf32>
      %cst_23 = arith.constant dense<0.000000e+00> : vector<128x128xf32>
      %30 = tpu.matmul %28, %29, %cst_23 {dimension_numbers = #tpu.dot_dimension_numbers<[1], [0], [0], [1], [0, 0, 1, 1], [], []>} : vector<128x128xbf16>, vector<128x128xf32>, vector<128x128xf32> -> vector<128x128xf32>
      %c0_24 = arith.constant 0 : index
      %c0_25 = arith.constant 0 : index
      %31 = vector.load %arg10[%c0_24, %c0_25] : memref<128x128xf32, #tpu.memory_space<vmem>>, vector<128x128xf32>
      tpu.vector_store %arg10[%c0_24, %c0_25], %30 {strides = array<i32>} : memref<128x128xf32, #tpu.memory_space<vmem>>, vector<128x128xf32>,
    } else {
    }
    %c0 = arith.constant 0 : index
    %c0_1 = arith.constant 0 : index
    %3 = vector.load %arg2[%c0, %c0_1] : memref<128x256xbf16, #tpu.memory_space<vmem>>, vector<128x256xbf16>
    %c256_i32 = arith.constant 256 : i32
    %4 = arith.muli %arg1, %c256_i32 : i32
    %5 = tpu.assume_multiple %4, 256 : i32
    %6 = arith.index_cast %5 : i32 to index
    %c0_2 = arith.constant 0 : index
    %7 = vector.load %arg3[%6, %c0_2] : memref<256x128xbf16, #tpu.memory_space<vmem>>, vector<256x128xbf16>
    %c0_3 = arith.constant 0 : index
    %c0_4 = arith.constant 0 : index
    %8 = vector.load %arg8[%c0_3, %c0_4] : memref<128x128xf32, #tpu.memory_space<vmem>>, vector<128x128xf32>
    %cst = arith.constant dense<0.000000e+00> : vector<128x128xf32>
    %9 = tpu.matmul %3, %7, %cst {dimension_numbers = #tpu.dot_dimension_numbers<[1], [0], [0], [1], [0, 0, 1, 1], [], []>} : vector<128x256xbf16>, vector<256x128xbf16>, vector<128x128xf32> -> vector<128x128xf32>
    %10 = arith.addf %8, %9 : vector<128x128xf32>
    %c0_5 = arith.constant 0 : index
    %c0_6 = arith.constant 0 : index
    %11 = vector.load %arg8[%c0_5, %c0_6] : memref<128x128xf32, #tpu.memory_space<vmem>>, vector<128x128xf32>
    tpu.vector_store %arg8[%c0_5, %c0_6], %10 {strides = array<i32>} : memref<128x128xf32, #tpu.memory_space<vmem>>, vector<128x128xf32>,
    %c0_7 = arith.constant 0 : index
    %c0_8 = arith.constant 0 : index
    %12 = vector.load %arg9[%c0_7, %c0_8] : memref<128x1xf32, #tpu.memory_space<vmem>>, vector<128x1xf32>
    %13 = arith.extf %3 : vector<128x256xbf16> to vector<128x256xf32>
    %cst_9 = arith.constant dense<0.000000e+00> : vector<128xf32>
    %14 = vector.multi_reduction <add>, %13, %cst_9 [1] : vector<128x256xf32> to vector<128xf32>
    %15 = vector.shape_cast %14 : vector<128xf32> to vector<128x1xf32>
    %16 = arith.addf %12, %15 : vector<128x1xf32>
    %c0_10 = arith.constant 0 : index
    %c0_11 = arith.constant 0 : index
    %17 = vector.load %arg9[%c0_10, %c0_11] : memref<128x1xf32, #tpu.memory_space<vmem>>, vector<128x1xf32>
    tpu.vector_store %arg9[%c0_10, %c0_11], %16 {strides = array<i32>} : memref<128x1xf32, #tpu.memory_space<vmem>>, vector<128x1xf32>,
    %c0_i32_12 = arith.constant 0 : i32
    %18 = arith.cmpi eq, %arg1, %c0_i32_12 : i32
    %19 = arith.extui %18 : i1 to i32
    %c0_i32_13 = arith.constant 0 : i32
    %20 = arith.cmpi ne, %19, %c0_i32_13 : i32
    scf.if %20 {
      %c0_14 = arith.constant 0 : index
      %c0_15 = arith.constant 0 : index
      %21 = vector.load %arg9[%c0_14, %c0_15] : memref<128x1xf32, #tpu.memory_space<vmem>>, vector<128x1xf32>
      %cst_16 = arith.constant 0.000000e+00 : f32
      %22 = vector.broadcast %cst_16 : f32 to vector<128x1xf32>
      %23 = arith.cmpf ogt, %21, %22 : vector<128x1xf32>
      %cst_17 = arith.constant 1.000000e+00 : f32
      %24 = vector.broadcast %cst_17 : f32 to vector<128x1xf32>
      %25 = arith.divf %24, %21 : vector<128x1xf32>
      %cst_18 = arith.constant 0.000000e+00 : f32
      %26 = vector.broadcast %cst_18 : f32 to vector<128x1xf32>
      %27 = arith.select %23, %25, %26 : vector<128x1xi1>, vector<128x1xf32>
      %c0_19 = arith.constant 0 : index
      %c0_20 = arith.constant 0 : index
      %28 = vector.load %arg8[%c0_19, %c0_20] : memref<128x128xf32, #tpu.memory_space<vmem>>, vector<128x128xf32>
      %29 = vector.broadcast %27 : vector<128x1xf32> to vector<128x128xf32>
      %30 = arith.mulf %28, %29 : vector<128x128xf32>
      %c0_21 = arith.constant 0 : index
      %c0_22 = arith.constant 0 : index
      %31 = vector.load %arg4[%c0_21, %c0_22] : memref<128x128xf32, #tpu.memory_space<vmem>>, vector<128x128xf32>
      %cst_23 = arith.constant dense<0.000000e+00> : vector<128x128xf32>
      %32 = tpu.matmul %30, %31, %cst_23 {dimension_numbers = #tpu.dot_dimension_numbers<[1], [0], [0], [1], [0, 0, 1, 1], [], []>} : vector<128x128xf32>, vector<128x128xf32>, vector<128x128xf32> -> vector<128x128xf32>
      %c0_24 = arith.constant 0 : index
      %c0_25 = arith.constant 0 : index
      %33 = vector.load %arg10[%c0_24, %c0_25] : memref<128x128xf32, #tpu.memory_space<vmem>>, vector<128x128xf32>
      %34 = arith.addf %32, %33 : vector<128x128xf32>
      %c0_26 = arith.constant 0 : index
      %c0_27 = arith.constant 0 : index
      %35 = vector.load %arg6[%c0_26, %c0_27] : memref<1x128xf32, #tpu.memory_space<vmem>>, vector<1x128xf32>
      %36 = vector.broadcast %35 : vector<1x128xf32> to vector<128x128xf32>
      %37 = arith.addf %34, %36 : vector<128x128xf32>
      %cst_28 = arith.constant 0.000000e+00 : f32
      %38 = vector.broadcast %cst_28 : f32 to vector<128x128xf32>
      %39 = arith.maximumf %37, %38 : vector<128x128xf32>
      %40 = arith.truncf %39 : vector<128x128xf32> to vector<128x128xbf16>
      %c0_29 = arith.constant 0 : index
      %c0_30 = arith.constant 0 : index
      %41 = vector.load %arg7[%c0_29, %c0_30] : memref<128x128xbf16, #tpu.memory_space<vmem>>, vector<128x128xbf16>
      tpu.vector_store %arg7[%c0_29, %c0_30], %40 {strides = array<i32>} : memref<128x128xbf16, #tpu.memory_space<vmem>>, vector<128x128xbf16>,
    } else {
    }
    return
  }
  func.func @transform_0(%arg0: i32, %arg1: i32) -> (i32, i32) {
    %c0_i32 = arith.constant 0 : i32
    return %arg0, %arg1 : i32, i32
  }
  func.func @transform_1(%arg0: i32, %arg1: i32) -> (i32, i32) {
    %c0_i32 = arith.constant 0 : i32
    %c0_i32_0 = arith.constant 0 : i32
    %c0_i32_1 = arith.constant 0 : i32
    return %c0_i32, %c0_i32_0 : i32, i32
  }
  func.func @transform_2(%arg0: i32, %arg1: i32) -> (i32, i32) {
    %c0_i32 = arith.constant 0 : i32
    %c0_i32_0 = arith.constant 0 : i32
    %c0_i32_1 = arith.constant 0 : i32
    return %c0_i32, %c0_i32_0 : i32, i32
  }
  func.func @transform_3(%arg0: i32, %arg1: i32) -> (i32, i32) {
    %c0_i32 = arith.constant 0 : i32
    %c0_i32_0 = arith.constant 0 : i32
    %c0_i32_1 = arith.constant 0 : i32
    return %c0_i32, %c0_i32_0 : i32, i32
  }
  func.func @transform_4(%arg0: i32, %arg1: i32) -> (i32, i32) {
    %c0_i32 = arith.constant 0 : i32
    %c0_i32_0 = arith.constant 0 : i32
    %c0_i32_1 = arith.constant 0 : i32
    return %c0_i32, %c0_i32_0 : i32, i32
  }
  func.func @transform_5(%arg0: i32, %arg1: i32) -> (i32, i32) {
    %c0_i32 = arith.constant 0 : i32
    %c0_i32_0 = arith.constant 0 : i32
    return %arg0, %c0_i32 : i32, i32
  }
}

</mosaic_0001>

<bundles_post_ra>
// kernel: tpu_custom_call.1
= control target key start
LH: loop header
LB: loop body
LE: loop exit
PB: predicated region body
PF: predicated region fallthrough
CT: control target
= control target key end

     0   :  { %s3048_s0 = inlined_call_operand.hbm [shape: bf16[256,256], index: 0, kind: input, shape index: {}]   ;;  %s3049_s1 = inlined_call_operand.hbm [shape: bf16[256,128], index: 1, kind: input, shape index: {}]   ;;  %s3050_s2 = inlined_call_operand.hbm [shape: f32[128,128], index: 2, kind: input, shape index: {}]   ;;  %s3051_s3 = inlined_call_operand.hbm [shape: f32[128,128], index: 3, kind: input, shape index: {}]   ;;  %s3052_s4 = inlined_call_operand.vmem [shape: f32[1,128], index: 4, kind: input, shape index: {}]   ;;  %s3053_s5 = inlined_call_operand.hbm [shape: bf16[256,128], index: 5, kind: output, shape index: {}]  }
   0x1   :  { %3059 = sst [smem:[#allocation19_spill]] %s3049_s1 }
   0x2   :  { %10 = vsyncpa [#allocation6], 0 }
   0x3   :  { %12 = vsyncpa [#allocation6 + $0x1], 0 }
   0x4   :  { %13 = vsyncpa [#allocation9], 0 }
   0x5   :  { %14 = vsyncpa [#allocation12], 0 }
   0x6   :  { %15 = vsyncpa [#allocation7], 0 }
   0x7   :  { %17 = vsyncpa [#allocation7 + $0x1], 0  ;;  %s2559_s18 = smov 0   ;;  %s2561_s19 = smov 0  }
   0x8   :  { %s2563_s20 = smov 0   ;;  %s2565_s21 = smov 0  }
   0x9   :  { %s2567_s22 = smov 0   ;;  %s2569_s23 = smov 0  }
   0xa LB: > { %s1700_s24 = sadd.s32 4294967295, %s2514_s23   ;;  %s1701_s25 = sadd.s32 4294967294, %s2514_s23   ;;  %s2514_s23 = sphi %s2569_s23, %s23_s23   ;;  %s2510_s22 = sphi %s2567_s22, %s3083_s22   ;;  %s2506_s21 = sphi %s2565_s21, %s3082_s21   ;;  %s2502_s20 = sphi %s2563_s20, %s3081_s20   ;;  %s2498_s19 = sphi %s2561_s19, %s3080_s19   ;;  %s2494_s18 = sphi %s2559_s18, %s3079_s18  }
   0xb   : > { %p57_p0 = scmp.ne.s32.totalorder %s2498_s19, %s2494_s18  ;;  %p2593_p1 = scmp.eq.s32.totalorder %s1700_s24, 0 }
   0xc   : > { %p2597_p2 = scmp.eq.s32.totalorder %s1700_s24, 1  ;;  %p171_p3 = scmp.eq.s32.totalorder %s1701_s25, 1 }
   0xd   : > { %s3060_s26 = scalar_select %p2593_p1, 1, 0 }
   0xe   : > { %s3061_s27 = scalar_select %p2597_p2, 1, 0 }
   0xf   : > { %p2603_p4 = por %p2593_p1, %p57_p0  ;;  %p1702_p5 = scmp.ge.s32.totalorder %s2514_s23, 1 }
  0x10   : > { %p2608_p6 = por %p171_p3, %p57_p0  ;;  %p178_p7 = scmp.lt.s32.totalorder %s2514_s23, 3 }
  0x11   : > { %s3062_s28 = scalar_select %p2603_p4, 1, 0 }
  0x12   : > { %s3063_s29 = scalar_select %p2608_p6, 1, 0 }
  0x13   : > { %p2613_p8 = pnand %p1702_p5, %p178_p7  ;;  %s2516_s6 = smov [#allocation8]  }
  0x14   : > { %3064 = sst [smem:[#allocation18_spill]] %s3063_s29  ;;  %s190_s7 = sshll.u32 %s2516_s6, 4  ;;  %s2617_s7 = int_to_ptr.vmem [resolvable:$true] %s190_s7 }
  0x15   : > { %s3065_s30 = scalar_select %p2613_p8, 1, 0 }
  0x16   : > { %p2151_p9 = pneg %p2613_p8  ;;  %s2517_s9 = smov [#allocation10]  }
  0x17   : > { %s203_s10 = sshll.u32 %s2517_s9, 4  ;;  %s3067_s1 = sld [smem:[#allocation19_spill]]  ;;  %s2628_s10 = int_to_ptr.vmem [resolvable:$true] %s203_s10 }
  0x18   : > { %p2624_p11 = pnand %p2151_p9, %p2593_p1 }
  0x1a   : > { %p2638_p13 = pneg %p2624_p11 }
  0x1d   : > { %s2310_s13 = scalar_lea.hbm %s3067_s1, 2048 }
  0x1e   : > { %p2311_p12 = scmp.ne.s32.totalorder %s3067_s1, %s2310_s13  ;;  %p2317_p5 = scmp.lt.u32.totalorder %s2310_s13, %s3067_s1 }
  0x20   : > { %p2313_p0 = pnand %p2638_p13, %p2311_p12 }
  0x22   : > { %p2314_p3 = pneg %p2313_p0 }
  0x24   : > { %p2319_p7 = pnand %p2317_p5, %p2314_p3 }
  0x26   : > { %2322 = shalt.err (!%p2319_p7)
}
  0x27   : > { %s2323_s25 = scalar_lea.vmem %s2617_s7, 2048  ;;  %p2331_p1 = scmp.lt.s32.totalorder %s2617_s7, %s2617_s7 }
  0x28   : > { %p2324_p9 = scmp.ne.s32.totalorder %s2617_s7, %s2323_s25  ;;  %p2332_p4 = scmp.lt.s32.totalorder %s2323_s25, %s2323_s25 }
  0x2a   : > { %p2326_p10 = pnand %p2324_p9, %p2638_p13  ;;  %p2333_p12 = por %p2332_p4, %p2331_p1 }
  0x2c   : > { %p2327_p6 = pneg %p2326_p10 }
  0x2e   : > { %p2334_p0 = pnand %p2333_p12, %p2327_p6 }
  0x30   : > { %2337 = shalt.err (!%p2334_p0)
}
  0x31   : > { %s2518_s6 = smov 64   ;;  %s2519_s9 = smov 4  }
  0x32   : > { %2154 = dma.hbm_to_vmem [thread:$0]  (!%p2624_p11), %s3067_s1, 2048, %s2617_s7, [#allocation9], %s2518_s6, %s2518_s6, %s2519_s9  }
  0x33   : > { %s2338_s15 = scalar_lea.hbm %s3050_s2, 2048 }
  0x34   : > { %p2339_p1 = scmp.ne.s32.totalorder %s3050_s2, %s2338_s15  ;;  %p2345_p10 = scmp.lt.u32.totalorder %s2338_s15, %s3050_s2 }
  0x36   : > { %p2341_p4 = pnand %p2339_p1, %p2638_p13 }
  0x38   : > { %p2342_p6 = pneg %p2341_p4 }
  0x3a   : > { %p2347_p3 = pnand %p2345_p10, %p2342_p6 }
  0x3c   : > { %2350 = shalt.err (!%p2347_p3)
}
  0x3d   : > { %s2351_s7 = scalar_lea.vmem %s2628_s10, 2048  ;;  %p2359_p12 = scmp.lt.s32.totalorder %s2628_s10, %s2628_s10 }
  0x3e   : > { %p2352_p5 = scmp.ne.s32.totalorder %s2628_s10, %s2351_s7  ;;  %p2360_p0 = scmp.lt.s32.totalorder %s2351_s7, %s2351_s7 }
  0x40   : > { %p2354_p7 = pnand %p2352_p5, %p2638_p13  ;;  %p2361_p1 = por %p2360_p0, %p2359_p12 }
  0x42   : > { %p2355_p9 = pneg %p2354_p7 }
  0x44   : > { %p2362_p4 = pnand %p2361_p1, %p2355_p9 }
  0x46   : > { %2365 = shalt.err (!%p2362_p4)
}
  0x47   : > { %s2520_s6 = smov 128   ;;  %s2521_s29 = smov 8  }
  0x48   : > { %2157 = dma.hbm_to_vmem [thread:$0]  (!%p2624_p11), %s3050_s2, 2048, %s2628_s10, [#allocation9], %s2520_s6, %s2520_s6, %s2521_s29  }
  0x49   : > { %s2522_s12 = smov [#allocation11]   ;;  %s2366_s17 = scalar_lea.hbm %s3051_s3, 2048 }
  0x4a   : > { %s216_s13 = sshll.u32 %s2522_s12, 4  ;;  %p2367_p6 = scmp.ne.s32.totalorder %s3051_s3, %s2366_s17  ;;  %s217_s13 = int_to_ptr.vmem [resolvable:$true] %s216_s13 }
  0x4b   : > { %p2373_p5 = scmp.lt.u32.totalorder %s2366_s17, %s3051_s3 }
  0x4c   : > { %p2369_p10 = pnand %p2367_p6, %p2638_p13 }
  0x4e   : > { %p2370_p3 = pneg %p2369_p10 }
  0x50   : > { %p2375_p7 = pnand %p2373_p5, %p2370_p3 }
  0x52   : > { %2378 = shalt.err (!%p2375_p7)
}
  0x53   : > { %s2379_s10 = scalar_lea.vmem %s217_s13, 2048  ;;  %p2387_p1 = scmp.lt.s32.totalorder %s217_s13, %s217_s13 }
  0x54   : > { %p2380_p9 = scmp.ne.s32.totalorder %s217_s13, %s2379_s10  ;;  %p2388_p4 = scmp.lt.s32.totalorder %s2379_s10, %s2379_s10 }
  0x56   : > { %p2382_p12 = pnand %p2380_p9, %p2638_p13  ;;  %p2389_p8 = por %p2388_p4, %p2387_p1 }
  0x58   : > { %p2383_p0 = pneg %p2382_p12 }
  0x5a   : > { %p2390_p2 = pnand %p2389_p8, %p2383_p0 }
  0x5c   : > { %2393 = shalt.err (!%p2390_p2)
}
  0x5d   : > { %2160 = dma.hbm_to_vmem [thread:$0]  (!%p2624_p11), %s3051_s3, 2048, %s217_s13, [#allocation12], %s2520_s6, %s2520_s6, %s2521_s29  }
  0x5e   : > { %s35_s16 = sadd.s32 1, %s2510_s22  ;;  %s44_s8 = sadd.s32 1, %s2502_s20 }
  0x5f   : > { %p37_p2 = scmp.ge.s32.totalorder %s35_s16, 2  ;;  %p51_p8 = scmp.ne.s32.totalorder %s2502_s20, %s2498_s19 }
  0x60   : > { %p52_p13 = scmp.eq.s32.totalorder %s2514_s23, 0  ;;  %p3070_p10 = scmp.ne.s32.totalorder %s3061_s27, 0 }
  0x61   : > { %s3085_s16 = smov (%p37_p2, %s35_s16), 0  ;;  %p2172_p11 = scmp.lt.s32.totalorder %s2514_s23, 2 }
  0x62   : > { %p2713_p6 = por %p52_p13, %p51_p8  ;;  %p2719_p3 = por %p3070_p10, %p51_p8 }
  0x63   : > { %s39_s14 = ssub.s32 %s2510_s22, %s3085_s16  ;;  %s233_s13 = sand.u32 1, %s2502_s20  }
  0x64   : > { %p42_p5 = scmp.eq.s32.totalorder %s39_s14, 0  ;;  %s1707_s15 = sshll.u32 %s233_s13, 7 }
  0x65   : > { %s1782_s24 = sshll.u32 %s2510_s22, 11  ;;  %s237_s27 = scalar_lea.vmem [#allocation5], %s1707_s15 }
  0x66   : > { %s2728_s17 = scalar_select %p42_p5, %s2502_s20, %s44_s8  }
  0x67   : > { %s2734_s10 = scalar_lea.hbm %s3048_s0, %s1782_s24  ;;  %s247_s1 = sshll.u32 %s237_s27, 4  ;;  %s2736_s1 = int_to_ptr.vmem [resolvable:$true] %s247_s1 }
  0x68   : > { %p2740_p7 = pnand %p2172_p11, %p2713_p6  ;;  %s2744_s8 = scalar_lea.sflag [#allocation6], %s233_s13 }
  0x69   : > { %s2394_s14 = scalar_lea.hbm %s2734_s10, 2048  ;;  %s2399_s11 = scalar_lea.hbm %s3048_s0, 4096 }
  0x6a   : > { %p2395_p9 = scmp.ne.s32.totalorder %s2734_s10, %s2394_s14  ;;  %p2396_p12 = pneg %p2740_p7 }
  0x6b   : > { %p2400_p4 = scmp.lt.u32.totalorder %s2734_s10, %s3048_s0  ;;  %p2401_p2 = scmp.lt.u32.totalorder %s2399_s11, %s2394_s14 }
  0x6c   : > { %p2397_p0 = pnand %p2396_p12, %p2395_p9  ;;  %p2403_p13 = scmp.lt.u32.totalorder %s2394_s14, %s2734_s10 }
  0x6d   : > { %p2402_p8 = por %p2401_p2, %p2400_p4 }
  0x6e   : > { %p2398_p1 = pneg %p2397_p0 }
  0x6f   : > { %p2404_p6 = por %p2403_p13, %p2402_p8 }
  0x71   : > { %p2405_p10 = pnand %p2404_p6, %p2398_p1 }
  0x73   : > { %2408 = shalt.err (!%p2405_p10)
}
  0x74   : > { %s2409_s13 = scalar_lea.vmem %s2736_s1, 2048  ;;  %s2523_s27 = smov [#allocation5]  }
  0x75   : > { %p2410_p11 = scmp.ne.s32.totalorder %s2736_s1, %s2409_s13  ;;  %s2414_s15 = sshll.u32 %s2523_s27, 4  ;;  %s2415_s15 = int_to_ptr.vmem [resolvable:$false] %s2414_s15 }
  0x76   : > { %s2416_s24 = scalar_lea.vmem %s2415_s15, 4096  ;;  %p2417_p0 = scmp.lt.s32.totalorder %s2736_s1, %s2415_s15 }
  0x77   : > { %p2412_p5 = pnand %p2410_p11, %p2396_p12  ;;  %p2418_p4 = scmp.lt.s32.totalorder %s2416_s24, %s2409_s13 }
  0x79   : > { %p2413_p9 = pneg %p2412_p5  ;;  %p2419_p2 = por %p2418_p4, %p2417_p0 }
  0x7b   : > { %p2420_p8 = pnand %p2419_p2, %p2413_p9 }
  0x7d   : > { %2423 = shalt.err (!%p2420_p8)
}
  0x7e   : > { %2164 = dma.hbm_to_vmem [thread:$0]  (!%p2740_p7), %s2734_s10, 2048, %s2736_s1, %s2744_s8, %s2520_s6, %s2520_s6, %s2521_s29  }
  0x7f   : > { %p3073_p12 = scmp.ne.s32.totalorder %s3065_s30, 0 }
  0x80   : > { %s2778_s14 = sand.u32 (!%p3073_p12), 1, %s2498_s19   ;;  %p3074_p1 = scmp.ne.s32.totalorder (!%p3073_p12), %s3062_s28, 0 }
  0x81   : > { %259 = sbr.rel (%p3073_p12) target bundleno = 722 (0x2d2), region = 40  ;;  %s1712_s11 = sshll.u32 (!%p3073_p12), %s2778_s14, 7 }
  0x82   : > { %s262_s25 = scalar_lea.sflag (!%p3073_p12), [#allocation6], %s2778_s14  ;;  %s2782_s7 = scalar_lea.vmem (!%p3073_p12), [#allocation5], %s1712_s11 }
  0x88   : > { %2477 = dma.done.wait (%p3074_p1), %s262_s25, 2048  }
  0x89   : > { %2479 = vsyncadd (%p3074_p1), %s262_s25, 4294965248  ;;  %p3075_p7 = scmp.ne.s32.totalorder %s3060_s26, 0 }
  0x8b   : > { %2481 = dma.done.wait (%p3075_p7), [#allocation9], 4096  }
  0x8c   : > { %2483 = vsyncadd (%p3075_p7), [#allocation9], 4294963200 }
  0x8d   : > { %2485 = dma.done.wait (%p3075_p7), [#allocation12], 2048  }
  0x8e   : > { %2487 = vsyncadd (%p3075_p7), [#allocation12], 4294965248  ;;  %vm328_vm0 = vcmask 7168   ;;  %v2524_v0 = vmov 0.0   ;;  %v2813_v1 = vld [vmem:[%s2782_s7 + $0x10] sm:$0xff]  ;;  %v2816_v2 = vld [vmem:[%s2782_s7] sm:$0xff] }
  0x8f   : > { %331 = vst.msk [vmem:[#allocation3 + $0x10] sm:$0xff] %vm328_vm0, %v2524_v0  ;;  %329 = vst.msk [vmem:[#allocation3] sm:$0xff] %vm328_vm0, %v2524_v0  ;;  %v2819_v3 = vld [vmem:[%s2782_s7 + $0x18] sm:$0xff]  ;;  %v969_v4 = vunpack.c.l.bf16 %v2813_v1  ;;  %v970_v5 = vunpack.c.h.bf16 %v2813_v1  ;;  %v965_v6 = vunpack.c.l.bf16 %v2816_v2  ;;  %v966_v7 = vunpack.c.h.bf16 %v2816_v2  ;;  %v2826_v8 = vld [vmem:[%s2782_s7 + $0x8] sm:$0xff]  ;;  %s1717_s26 = sshll.u32 %s2506_s21, 7  ;;  %s1716_s1 = sshll.u32 %s2778_s14, 6 }
  0x90   : > { %330 = vst.msk [vmem:[#allocation3 + $0x8] sm:$0xff] %vm328_vm0, %v2524_v0  ;;  %332 = vst.msk [vmem:[#allocation3 + $0x18] sm:$0xff] %vm328_vm0, %v2524_v0  ;;  %v2829_v9 = vld [vmem:[%s2782_s7 + $0x28] sm:$0xff]  ;;  %v971_v10 = vunpack.c.l.bf16 %v2819_v3  ;;  %v972_v11 = vunpack.c.h.bf16 %v2819_v3  ;;  %v967_v12 = vunpack.c.l.bf16 %v2826_v8  ;;  %v968_v13 = vunpack.c.h.bf16 %v2826_v8  ;;  %v2836_v14 = vld [vmem:[%s2782_s7 + $0x20] sm:$0xff]  ;;  %s346_s28 = sshra.s32 %s1717_s26, 3  ;;  %s2965_s9 = scalar_lea.vmem [#allocation13], %s1716_s1 }
  0x91   : > { %333 = vst.msk [vmem:[#allocation3 + $0x20] sm:$0xff] %vm328_vm0, %v2524_v0  ;;  %334 = vst.msk [vmem:[#allocation3 + $0x28] sm:$0xff] %vm328_vm0, %v2524_v0  ;;  %v1003_v15 = vadd.f32 %v970_v5, %v969_v4  ;;  %v997_v16 = vadd.f32 %v966_v7, %v965_v6  ;;  %v2238_v17 = vld [vmem:[#allocation8 + $0x40] sm:$0xff]   ;;  %v975_v18 = vunpack.c.l.bf16 %v2829_v9  ;;  %v976_v19 = vunpack.c.h.bf16 %v2829_v9  ;;  %v2841_v20 = vld [vmem:[%s2782_s7 + $0x38] sm:$0xff]  ;;  %s1718_s30 = sshll.u32 %s346_s28, 2  ;;  %s1799_s8 = sshll.u32 %s2506_s21, 10 }
  0x92   : > { %335 = vst.msk [vmem:[#allocation3 + $0x30] sm:$0xff] %vm328_vm0, %v2524_v0  ;;  %336 = vst.msk [vmem:[#allocation3 + $0x38] sm:$0xff] %vm328_vm0, %v2524_v0  ;;  %v2239_v21 = vld [vmem:[#allocation8] sm:$0xff]   ;;  %v1006_v22 = vadd.f32 %v972_v11, %v971_v10  ;;  %v1000_v23 = vadd.f32 %v968_v13, %v967_v12  ;;  %v973_v24 = vunpack.c.l.bf16 %v2836_v14  ;;  %v974_v25 = vunpack.c.h.bf16 %v2836_v14  ;;  %v2240_v26 = vld [vmem:[#allocation8 + $0x48] sm:$0xff]   ;;  %1871 = vmatprep.subr.bf16.mxu1 %v2238_v17  ;;  %s2925_s6 = scalar_lea.vmem [#allocation8], %s1718_s30  ;;  %s1583_s13 = sshll.u32 %s2965_s9, 4  ;;  %s2998_s13 = int_to_ptr.vmem [resolvable:$true] %s1583_s13 }
  0x93   : > { %337 = vst.msk [vmem:[#allocation3 + $0x40] sm:$0xff] %vm328_vm0, %v2524_v0  ;;  %338 = vst.msk [vmem:[#allocation3 + $0x48] sm:$0xff] %vm328_vm0, %v2524_v0  ;;  %1004 = vadd.xlane.f32.xlu1 %v1003_v15  ;;  %998 = vadd.xlane.f32.xlu0 %v997_v16  ;;  %v2846_v27 = vld [vmem:[%s2782_s7 + $0x30] sm:$0xff]  ;;  %v2241_v28 = vld [vmem:[#allocation8 + $0x8] sm:$0xff]   ;;  %v1728_v29 = vcombine.high %v2816_v2, %v2826_v8  ;;  %v1012_v30 = vadd.f32 %v976_v19, %v975_v18  ;;  %v979_v31 = vunpack.c.l.bf16 %v2841_v20  ;;  %s2996_s24 = scalar_lea.hbm %s3053_s5, %s1799_s8  ;;  %s1570_s11 = scalar_lea.sflag [#allocation7], %s2778_s14 }
  0x94   : > { %339 = vst.msk [vmem:[#allocation3 + $0x50] sm:$0xff] %vm328_vm0, %v2524_v0  ;;  %340 = vst.msk [vmem:[#allocation3 + $0x58] sm:$0xff] %vm328_vm0, %v2524_v0  ;;  %1872 = vmatpush3.bf16.msra.mxu1 %v2239_v21  ;;  %v2242_v32 = vld [vmem:[#allocation8 + $0x50] sm:$0xff]   ;;  %v1009_v33 = vadd.f32 %v974_v25, %v973_v24  ;;  %v980_v34 = vunpack.c.h.bf16 %v2841_v20  ;;  %v977_v35 = vunpack.c.l.bf16 %v2846_v27  ;;  %v978_v36 = vunpack.c.h.bf16 %v2846_v27  ;;  %v2855_v37 = vld [vmem:[%s2782_s7 + $0x48] sm:$0xff]  ;;  %s2424_s25 = scalar_lea.vmem %s2998_s13, 1024  ;;  %s2526_s21 = smov [#allocation13]  }
  0x95   : > { %341 = vst.msk [vmem:[#allocation3 + $0x60] sm:$0xff] %vm328_vm0, %v2524_v0  ;;  %342 = vst.msk [vmem:[#allocation3 + $0x68] sm:$0xff] %vm328_vm0, %v2524_v0  ;;  %1873 = vmatprep.subr.bf16.mxu1 %v2240_v26  ;;  %v2858_v38 = vld [vmem:[%s2782_s7 + $0x40] sm:$0xff]  ;;  %852 = vmatprep.mubr.bf16.mxu1 %v1728_v29  ;;  %v2243_v39 = vld [vmem:[#allocation8 + $0x10] sm:$0xff]   ;;  %v983_v40 = vunpack.c.l.bf16 %v2855_v37  ;;  %v984_v41 = vunpack.c.h.bf16 %v2855_v37  ;;  %v1727_v25 = vcombine.low %v2816_v2, %v2826_v8  ;;  %p2425_p13 = scmp.ne.s32.totalorder %s2998_s13, %s2424_s25 }
  0x96   : > { %343 = vst.msk [vmem:[#allocation3 + $0x70] sm:$0xff] %vm328_vm0, %v2524_v0  ;;  %344 = vst.msk [vmem:[#allocation3 + $0x78] sm:$0xff] %vm328_vm0, %v2524_v0  ;;  %v2244_v42 = vld [vmem:[#allocation8 + $0x58] sm:$0xff]   ;;  %v1018_v43 = vadd.f32 %v980_v34, %v979_v31  ;;  %v1015_v44 = vadd.f32 %v978_v36, %v977_v35  ;;  %v981_v46 = vunpack.c.l.bf16 %v2858_v38  ;;  %v982_v47 = vunpack.c.h.bf16 %v2858_v38  ;;  %v2868_v48 = vld [vmem:[%s2782_s7 + $0x50] sm:$0xff] }
  0x97   : > { %1007 = vadd.xlane.f32.xlu1 %v1006_v22  ;;  %1001 = vadd.xlane.f32.xlu0 %v1000_v23  ;;  %v2863_v45 = vld [vmem:[%s2782_s7 + $0x58] sm:$0xff]  ;;  %v1024_v50 = vadd.f32 %v984_v41, %v983_v40  ;;  %v2246_v52 = vld [vmem:[#allocation8 + $0x60] sm:$0xff]   ;;  %v2873_v55 = vld [vmem:[%s2782_s7 + $0x68] sm:$0xff]  ;;  %v985_v56 = vunpack.c.l.bf16 %v2868_v48  ;;  %v986_v57 = vunpack.c.h.bf16 %v2868_v48  ;;  %v1730_v26 = vcombine.high %v2813_v1, %v2819_v3  ;;  %p2426_p6 = pnand %p2425_p13, %p2719_p3 }
  0x98   : > { %1874 = vmatpush3.bf16.msra.mxu1 %v2241_v28  ;;  %v2245_v49 = vld [vmem:[#allocation8 + $0x18] sm:$0xff]   ;;  %v987_v51 = vunpack.c.l.bf16 %v2863_v45  ;;  %v988_v53 = vunpack.c.h.bf16 %v2863_v45  ;;  %v1021_v54 = vadd.f32 %v982_v47, %v981_v46  ;;  %v2878_v58 = vld [vmem:[%s2782_s7 + $0x60] sm:$0xff]  ;;  %v991_v60 = vunpack.c.l.bf16 %v2873_v55  ;;  %v2248_v62 = vld [vmem:[#allocation8 + $0x68] sm:$0xff]  }
  0x99   : > { %1875 = vmatprep.subr.bf16.mxu1 %v2242_v32  ;;  %v2247_v59 = vld [vmem:[#allocation8 + $0x20] sm:$0xff]   ;;  %v992_v61 = vunpack.c.h.bf16 %v2873_v55  ;;  %v1027_v0 = vadd.f32 %v986_v57, %v985_v56  ;;  %v2883_v4 = vld [vmem:[%s2782_s7 + $0x78] sm:$0xff]  ;;  %v989_v5 = vunpack.c.l.bf16 %v2878_v58  ;;  %v990_v6 = vunpack.c.h.bf16 %v2878_v58  ;;  %v2888_v7 = vld [vmem:[%s2782_s7 + $0x70] sm:$0xff]  ;;  %p2427_p10 = pneg %p2426_p6  ;;  %s2428_s7 = sshll.u32 %s2526_s21, 4  ;;  %s2429_s7 = int_to_ptr.vmem [resolvable:$false] %s2428_s7 }
  0x9a   : > { %v1030_v63 = vadd.f32 %v988_v53, %v987_v51  ;;  %v2249_v10 = vld [vmem:[#allocation8 + $0x28] sm:$0xff]   ;;  %v995_v12 = vunpack.c.l.bf16 %v2883_v4  ;;  %v2250_v13 = vld [vmem:[#allocation8 + $0x70] sm:$0xff]   ;;  %v996_v15 = vunpack.c.h.bf16 %v2883_v4  ;;  %v993_v17 = vunpack.c.l.bf16 %v2888_v7  ;;  %v2252_v21 = vld [vmem:[#allocation8 + $0x78] sm:$0xff]   ;;  %s2430_s26 = scalar_lea.vmem %s2429_s7, 2048  ;;  %p2431_p11 = scmp.lt.s32.totalorder %s2998_s13, %s2429_s7 }
  0x9b   : > { %1013 = vadd.xlane.f32.xlu1 %v1012_v30  ;;  %1010 = vadd.xlane.f32.xlu0 %v1009_v33  ;;  %v1036_v11 = vadd.f32 %v992_v61, %v991_v60  ;;  %v1033_v16 = vadd.f32 %v990_v6, %v989_v5  ;;  %v994_v18 = vunpack.c.h.bf16 %v2888_v7  ;;  %v2251_v19 = vld [vmem:[#allocation8 + $0x30] sm:$0xff]   ;;  %v2253_v24 = vld [vmem:[#allocation8 + $0x38] sm:$0xff]   ;;  %v2525_v28 = vmov 0   ;;  %v366_v33 = vld [vmem:[#allocation11] sm:$0xff]  ;;  %p2432_p5 = scmp.lt.s32.totalorder %s2430_s26, %s2424_s25 }
  0x9c   : > { %1876 = vmatpush3.bf16.msra.mxu1 %v2243_v39  ;;  %v1042_v22 = vadd.f32 %v996_v15, %v995_v12  ;;  %2236 = vset.pattern.permute.xlu0 %v2525_v28  ;;  %v1729_v29 = vcombine.low %v2813_v1, %v2819_v3  ;;  %v1732_v30 = vcombine.high %v2836_v14, %v2829_v9  ;;  %v367_v34 = vld [vmem:[#allocation11 + $0x8] sm:$0xff]  ;;  %v368_v35 = vld [vmem:[#allocation11 + $0x10] sm:$0xff]  ;;  %v370_v39 = vld [vmem:[#allocation11 + $0x20] sm:$0xff] }
  0x9d   : > { %1877 = vmatprep.subr.bf16.mxu1 %v2244_v42  ;;  %v1039_v23 = vadd.f32 %v994_v18, %v993_v17  ;;  %2237 = vset.pattern.permute.xlu1 %v2525_v28  ;;  %v1731_v2 = vcombine.low %v2836_v14, %v2829_v9  ;;  %v1734_v8 = vcombine.high %v2846_v27, %v2841_v20  ;;  %v371_v40 = vld [vmem:[#allocation11 + $0x28] sm:$0xff]  ;;  %v372_v41 = vld [vmem:[#allocation11 + $0x30] sm:$0xff]  ;;  %v374_v46 = vld [vmem:[#allocation11 + $0x40] sm:$0xff]  ;;  %p2433_p9 = por %p2432_p5, %p2431_p11 }
  0x9e   : > { %v1733_v31 = vcombine.low %v2846_v27, %v2841_v20  ;;  %v1736_v32 = vcombine.high %v2858_v38, %v2855_v37  ;;  %v1735_v1 = vcombine.low %v2858_v38, %v2855_v37  ;;  %v1738_v3 = vcombine.high %v2868_v48, %v2863_v45  ;;  %v369_v37 = vld [vmem:[#allocation11 + $0x18] sm:$0xff]  ;;  %v375_v47 = vld [vmem:[#allocation11 + $0x48] sm:$0xff]  ;;  %v378_v53 = vld [vmem:[#allocation11 + $0x60] sm:$0xff] }
  0x9f   : > { %1019 = vadd.xlane.f32.xlu1 %v1018_v43  ;;  %1016 = vadd.xlane.f32.xlu0 %v1015_v44  ;;  %v1737_v9 = vcombine.low %v2868_v48, %v2863_v45  ;;  %v1740_v14 = vcombine.high %v2878_v58, %v2873_v55  ;;  %v1739_v20 = vcombine.low %v2878_v58, %v2873_v55  ;;  %v373_v44 = vld [vmem:[#allocation11 + $0x38] sm:$0xff]  ;;  %v2270_v45 = vld [vmem:[%s2925_s6] sm:$0xff]   ;;  %v380_v56 = vld [vmem:[#allocation11 + $0x70] sm:$0xff]  ;;  %p2434_p0 = pnand %p2433_p9, %p2427_p10 }
  0xa0   : > { %1878 = vmatpush3.bf16.msra.mxu1 %v2245_v49  ;;  %v1742_v27 = vcombine.high %v2888_v7, %v2883_v4  ;;  %v2071_v36 = vpack.c.bf16 %v367_v34, %v366_v33  ;;  %v2075_v38 = vpack.c.bf16 %v369_v37, %v368_v35  ;;  %v1741_v42 = vcombine.low %v2888_v7, %v2883_v4  ;;  %v377_v51 = vld [vmem:[#allocation11 + $0x58] sm:$0xff]  ;;  %v1274_v60 = vld [vmem:[#allocation10 + $0x8] sm:$0xff]  ;;  %v2272_v5 = vld [vmem:[%s2925_s6 + $0x10] sm:$0xff]  }
  0xa1   : > { %1879 = vmatprep.subr.bf16.mxu1 %v2246_v52  ;;  %v2079_v43 = vpack.c.bf16 %v371_v40, %v370_v39  ;;  %1999 = vmatprep.mubr.bf16.mxu0 %v2270_v45  ;;  %v2083_v48 = vpack.c.bf16 %v373_v44, %v372_v41  ;;  %v2087_v49 = vpack.c.bf16 %v375_v47, %v374_v46  ;;  %v381_v57 = vld [vmem:[#allocation11 + $0x78] sm:$0xff]  ;;  %v1277_v6 = vld [vmem:[#allocation10 + $0x20] sm:$0xff]  ;;  %v1278_v7 = vld [vmem:[#allocation10 + $0x28] sm:$0xff] }
  0xa2   : > { %2072 = vmatprep.subr.bf16.mxu0 %v2071_v36  ;;  %v2099_v58 = vpack.c.bf16 %v381_v57, %v380_v56  ;;  %v1279_v12 = vld [vmem:[#allocation10 + $0x30] sm:$0xff]  ;;  %v1281_v17 = vld [vmem:[#allocation10 + $0x40] sm:$0xff]  ;;  %v1282_v18 = vld [vmem:[#allocation10 + $0x48] sm:$0xff] }
  0xa3   : > { %1025 = vadd.xlane.f32.xlu1 %v1024_v50  ;;  %1022 = vadd.xlane.f32.xlu0 %v1021_v54  ;;  %v376_v50 = vld [vmem:[#allocation11 + $0x50] sm:$0xff]  ;;  %v379_v54 = vld [vmem:[#allocation11 + $0x68] sm:$0xff]  ;;  %v956_v41 = vld [vmem:[#allocation3 + $0x38] sm:$0xff] }
  0xa4   : > { %1880 = vmatpush3.bf16.msra.mxu1 %v2247_v59  ;;  %2074 = vmatpush3.bf16.msra.mxu0 %v2071_v36  ;;  %v2091_v52 = vpack.c.bf16 %v377_v51, %v376_v50  ;;  %v2095_v55 = vpack.c.bf16 %v379_v54, %v378_v53  ;;  %v1273_v59 = vld [vmem:[#allocation10] sm:$0xff]  ;;  %v1286_v28 = vld [vmem:[#allocation10 + $0x68] sm:$0xff]  ;;  %v960_v56 = vld [vmem:[#allocation3 + $0x58] sm:$0xff] }
  0xa5   : > { %1881 = vmatprep.subr.bf16.mxu1 %v2248_v62  ;;  %2076 = vmatprep.subr.bf16.mxu0 %v2075_v38  ;;  %v2103_v61 = vpack.c.bf16 %v1274_v60, %v1273_v59  ;;  %v1275_v62 = vld [vmem:[#allocation10 + $0x10] sm:$0xff]  ;;  %v954_v35 = vld [vmem:[#allocation3 + $0x28] sm:$0xff]  ;;  %v953_v36 = vld [vmem:[#allocation3 + $0x20] sm:$0xff] }
  0xa6   : > { %v959_v57 = vld [vmem:[#allocation3 + $0x50] sm:$0xff] }
  0xa7   : > { %1031 = vadd.xlane.f32.xlu1 %v1030_v63  ;;  %1028 = vadd.xlane.f32.xlu0 %v1027_v0  ;;  %v1276_v63 = vld [vmem:[#allocation10 + $0x18] sm:$0xff]  ;;  %v2271_v0 = vld [vmem:[%s2925_s6 + $0x8] sm:$0xff]  }
  0xa8   : > { %1882 = vmatpush3.bf16.msra.mxu1 %v2249_v10  ;;  %2078 = vmatpush3.bf16.msra.mxu0 %v2075_v38  ;;  %v2107_v4 = vpack.c.bf16 %v1276_v63, %v1275_v62  ;;  %v2273_v10 = vld [vmem:[%s2925_s6 + $0x18] sm:$0xff]  }
  0xa9   : > { %1883 = vmatprep.subr.bf16.mxu1 %v2250_v13  ;;  %2080 = vmatprep.subr.bf16.mxu0 %v2079_v43  ;;  %v1280_v13 = vld [vmem:[#allocation10 + $0x38] sm:$0xff] }
  0xaa   : > { %v2115_v15 = vpack.c.bf16 %v1280_v13, %v1279_v12 }
  0xab   : > { %1037 = vadd.xlane.f32.xlu1 %v1036_v11  ;;  %1034 = vadd.xlane.f32.xlu0 %v1033_v16  ;;  %v2111_v11 = vpack.c.bf16 %v1278_v7, %v1277_v6  ;;  %v2274_v16 = vld [vmem:[%s2925_s6 + $0x20] sm:$0xff]   ;;  %v1287_v7 = vld [vmem:[#allocation10 + $0x70] sm:$0xff] }
  0xac   : > { %1884 = vmatpush3.bf16.msra.mxu1 %v2251_v19  ;;  %2082 = vmatpush3.bf16.msra.mxu0 %v2079_v43  ;;  %v2275_v19 = vld [vmem:[%s2925_s6 + $0x28] sm:$0xff]  }
  0xad   : > { %1885 = vmatprep.subr.bf16.mxu1 %v2252_v21  ;;  %2084 = vmatprep.subr.bf16.mxu0 %v2083_v48  ;;  %v2119_v21 = vpack.c.bf16 %v1282_v18, %v1281_v17  ;;  %v964_v17 = vld [vmem:[#allocation3 + $0x78] sm:$0xff] }
  0xaf   : > { %1043 = vadd.xlane.f32.xlu1 %v1042_v22  ;;  %1040 = vadd.xlane.f32.xlu0 %v1039_v23  ;;  %v1283_v22 = vld [vmem:[#allocation10 + $0x50] sm:$0xff]  ;;  %v1284_v23 = vld [vmem:[#allocation10 + $0x58] sm:$0xff] }
  0xb0   : > { %1886 = vmatpush3.bf16.msra.mxu1 %v2253_v24  ;;  %2086 = vmatpush3.bf16.msra.mxu0 %v2083_v48  ;;  %v2123_v24 = vpack.c.bf16 %v1284_v23, %v1283_v22  ;;  %v958_v48 = vld [vmem:[#allocation3 + $0x48] sm:$0xff] }
  0xb1   : > { %2088 = vmatprep.subr.bf16.mxu0 %v2087_v49 }
  0xb3   : > { %853 = vmatmul.mubr.bf16.vlgmr.msra.gmra.mrb[0].mxu1 %v1727_v25  ;;  %v2276_v25 = vld [vmem:[%s2925_s6 + $0x30] sm:$0xff]  }
  0xb4   : > { %860 = vmatprep.mubr.bf16.mxu1 %v1730_v26  ;;  %2090 = vmatpush3.bf16.msra.mxu0 %v2087_v49  ;;  %v1285_v26 = vld [vmem:[#allocation10 + $0x60] sm:$0xff] }
  0xb5   : > { %2092 = vmatprep.subr.bf16.mxu0 %v2091_v52  ;;  %v957_v49 = vld [vmem:[#allocation3 + $0x40] sm:$0xff] }
  0xb8   : > { %2094 = vmatpush3.bf16.msra.mxu0 %v2091_v52 }
  0xb9   : > { %2096 = vmatprep.subr.bf16.mxu0 %v2095_v55 }
  0xbb   : > { %861 = vmatmul.mubr.bf16.gmra.mrb[4].mxu1 %v1729_v29  ;;  %v2277_v29 = vld [vmem:[%s2925_s6 + $0x38] sm:$0xff]  }
  0xbc   : > { %868 = vmatprep.mubr.bf16.mxu1 %v1732_v30  ;;  %2098 = vmatpush3.bf16.msra.mxu0 %v2095_v55  ;;  %v2127_v30 = vpack.c.bf16 %v1286_v28, %v1285_v26 }
  0xbd   : > { %2100 = vmatprep.subr.bf16.mxu0 %v2099_v58 }
  0xc0   : > { %2102 = vmatpush3.bf16.msra.mxu0 %v2099_v58 }
  0xc1   : > { %2104 = vmatprep.subr.bf16.mxu0 %v2103_v61 }
  0xc3   : > { %869 = vmatmul.mubr.bf16.gmra.mrb[8].mxu1 %v1731_v2  ;;  %2000 = vmatmul.mubr.bf16.vlgmr.msra.gmra.mrb[0].mxu0 %v2271_v0  ;;  %v951_v2 = vld [vmem:[#allocation3 + $0x10] sm:$0xff] }
  0xc4   : > { %876 = vmatprep.mubr.bf16.mxu1 %v1734_v8  ;;  %2106 = vmatpush3.bf16.msra.mxu0 %v2103_v61  ;;  %v949_v8 = vld [vmem:[#allocation3] sm:$0xff] }
  0xc5   : > { %2108 = vmatprep.subr.bf16.mxu0 %v2107_v4  ;;  %2003 = vmatprep.mubr.bf16.mxu0 %v2272_v5  ;;  %v961_v5 = vld [vmem:[#allocation3 + $0x60] sm:$0xff] }
  0xc8   : > { %2110 = vmatpush3.bf16.msra.mxu0 %v2107_v4  ;;  %v962_v4 = vld [vmem:[#allocation3 + $0x68] sm:$0xff] }
  0xc9   : > { %2112 = vmatprep.subr.bf16.mxu0 %v2111_v11 }
  0xcb   : > { %877 = vmatmul.mubr.bf16.gmra.mrb[12].mxu1 %v1733_v31  ;;  %2004 = vmatmul.mubr.bf16.gmra.mrb[4].mxu0 %v2273_v10  ;;  %v1288_v10 = vld [vmem:[#allocation10 + $0x78] sm:$0xff] }
  0xcc   : > { %884 = vmatprep.mubr.bf16.mxu1 %v1736_v32  ;;  %2114 = vmatpush3.bf16.msra.mxu0 %v2111_v11  ;;  %v2131_v13 = vpack.c.bf16 %v1288_v10, %v1287_v7 }
  0xcd   : > { %2116 = vmatprep.subr.bf16.mxu0 %v2115_v15  ;;  %2007 = vmatprep.mubr.bf16.mxu0 %v2274_v16 }
  0xd0   : > { %2118 = vmatpush3.bf16.msra.mxu0 %v2115_v15 }
  0xd1   : > { %2120 = vmatprep.subr.bf16.mxu0 %v2119_v21 }
  0xd3   : > { %885 = vmatmul.mubr.bf16.gmra.mrb[16].mxu1 %v1735_v1  ;;  %2008 = vmatmul.mubr.bf16.gmra.mrb[8].mxu0 %v2275_v19 }
  0xd4   : > { %892 = vmatprep.mubr.bf16.mxu1 %v1738_v3  ;;  %2122 = vmatpush3.bf16.msra.mxu0 %v2119_v21  ;;  %v963_v21 = vld [vmem:[#allocation3 + $0x70] sm:$0xff] }
  0xd5   : > { %2124 = vmatprep.subr.bf16.mxu0 %v2123_v24  ;;  %2011 = vmatprep.mubr.bf16.mxu0 %v2276_v25 }
  0xd8   : > { %2126 = vmatpush3.bf16.msra.mxu0 %v2123_v24 }
  0xd9   : > { %2128 = vmatprep.subr.bf16.mxu0 %v2127_v30 }
  0xdb   : > { %893 = vmatmul.mubr.bf16.gmra.mrb[20].mxu1 %v1737_v9  ;;  %2012 = vmatmul.mubr.bf16.gmra.mrb[12].mxu0 %v2277_v29  ;;  %v952_v9 = vld [vmem:[#allocation3 + $0x18] sm:$0xff] }
  0xdc   : > { %900 = vmatprep.mubr.bf16.mxu1 %v1740_v14  ;;  %2130 = vmatpush3.bf16.msra.mxu0 %v2127_v30  ;;  %v950_v14 = vld [vmem:[#allocation3 + $0x8] sm:$0xff] }
  0xdd   : > { %2132 = vmatprep.subr.bf16.mxu0 %v2131_v13 }
  0xe0   : > { %2134 = vmatpush3.bf16.msra.mxu0 %v2131_v13 }
  0xe3   : > { %901 = vmatmul.mubr.bf16.gmra.mrb[24].mxu1 %v1739_v20 }
  0xe4   : > { %908 = vmatprep.mubr.bf16.mxu1 %v1742_v27 }
  0xeb   : > { %909 = vmatmul.mubr.bf16.gmra.mrb[28].mxu1 %v1741_v42  ;;  %v955_v42 = vld [vmem:[#allocation3 + $0x30] sm:$0xff] }
 0x120   : > { %v1005_v31 = vpop.xlane.xlu1 %1004  ;;  %v999_v32 = vpop.xlane.xlu0 %998 }
 0x121   : > { %v1047_v1 = vadd.f32 %v1005_v31, %v951_v2  ;;  %v1045_v3 = vadd.f32 %v999_v32, %v949_v8 }
 0x123   : > { %1064 = vst.msk [vmem:[#allocation3 + $0x10] sm:$0xff] %vm328_vm0, %v1047_v1  ;;  %1062 = vst.msk [vmem:[#allocation3] sm:$0xff] %vm328_vm0, %v1045_v3 }
 0x124   : > { %v1008_v20 = vpop.xlane.xlu1 %1007  ;;  %v1002_v27 = vpop.xlane.xlu0 %1001 }
 0x125   : > { %v1048_v33 = vadd.f32 %v1008_v20, %v952_v9  ;;  %v1046_v34 = vadd.f32 %v1002_v27, %v950_v14 }
 0x127   : > { %1065 = vst.msk [vmem:[#allocation3 + $0x18] sm:$0xff] %vm328_vm0, %v1048_v33  ;;  %1063 = vst.msk [vmem:[#allocation3 + $0x8] sm:$0xff] %vm328_vm0, %v1046_v34 }
 0x128   : > { %v1014_v37 = vpop.xlane.xlu1 %1013  ;;  %v1011_v38 = vpop.xlane.xlu0 %1010 }
 0x129   : > { %v1050_v39 = vadd.f32 %v1014_v37, %v954_v35  ;;  %v1049_v40 = vadd.f32 %v1011_v38, %v953_v36 }
 0x12a   : > { %v1081_v43 = vld [vmem:[#allocation3] sm:$0xff]  ;;  %v1083_v51 = vld [vmem:[#allocation3 + $0x10] sm:$0xff] }
 0x12b   : > { %1067 = vst.msk [vmem:[#allocation3 + $0x28] sm:$0xff] %vm328_vm0, %v1050_v39  ;;  %1066 = vst.msk [vmem:[#allocation3 + $0x20] sm:$0xff] %vm328_vm0, %v1049_v40  ;;  %2278 = vrcp.f32 %v1081_v43  ;;  %vm1097_vm1 = vcmp.gt.f32.partialorder %v1081_v43, 0.0  ;;  %vm1099_vm3 = vcmp.gt.f32.partialorder %v1083_v51, 0.0 }
 0x12c   : > { %v1020_v44 = vpop.xlane.xlu1 %1019  ;;  %v1017_v45 = vpop.xlane.xlu0 %1016 }
 0x12d   : > { %v1052_v46 = vadd.f32 %v1020_v44, %v956_v41  ;;  %v1051_v47 = vadd.f32 %v1017_v45, %v955_v42 }
 0x12e   : > { %v1082_v50 = vld [vmem:[#allocation3 + $0x8] sm:$0xff]  ;;  %v1084_v58 = vld [vmem:[#allocation3 + $0x18] sm:$0xff] }
 0x12f   : > { %1069 = vst.msk [vmem:[#allocation3 + $0x38] sm:$0xff] %vm328_vm0, %v1052_v46  ;;  %1068 = vst.msk [vmem:[#allocation3 + $0x30] sm:$0xff] %vm328_vm0, %v1051_v47  ;;  %2280 = vrcp.f32 %v1082_v50  ;;  %vm1098_vm2 = vcmp.gt.f32.partialorder %v1082_v50, 0.0  ;;  %vm1100_vm4 = vcmp.gt.f32.partialorder %v1084_v58, 0.0 }
 0x130   : > { %v1026_v52 = vpop.xlane.xlu1 %1025  ;;  %v1023_v53 = vpop.xlane.xlu0 %1022  ;;  %2282 = vrcp.f32 %v1083_v51 }
 0x131   : > { %v1054_v54 = vadd.f32 %v1026_v52, %v958_v48  ;;  %v1053_v55 = vadd.f32 %v1023_v53, %v957_v49  ;;  %2284 = vrcp.f32 %v1084_v58 }
 0x132   : > { %v1085_v6 = vld [vmem:[#allocation3 + $0x20] sm:$0xff]  ;;  %v1086_v23 = vld [vmem:[#allocation3 + $0x28] sm:$0xff] }
 0x133   : > { %1071 = vst.msk [vmem:[#allocation3 + $0x48] sm:$0xff] %vm328_vm0, %v1054_v54  ;;  %1070 = vst.msk [vmem:[#allocation3 + $0x40] sm:$0xff] %vm328_vm0, %v1053_v55  ;;  %2286 = vrcp.f32 %v1085_v6  ;;  %vm1101_vm6 = vcmp.gt.f32.partialorder %v1085_v6, 0.0  ;;  %vm1102_vm7 = vcmp.gt.f32.partialorder %v1086_v23, 0.0 }
 0x134   : > { %v1032_v59 = vpop.xlane.xlu1 %1031  ;;  %v1029_v60 = vpop.xlane.xlu0 %1028 }
 0x135   : > { %v2279_v61 = vpop.eup %2278  ;;  %v1056_v62 = vadd.f32 %v1032_v59, %v960_v56  ;;  %v1055_v63 = vadd.f32 %v1029_v60, %v959_v57 }
 0x136   : > { %v1145_v0 = vsel %vm1097_vm1, %v2279_v61, 0.0  ;;  %v1087_v8 = vld [vmem:[#allocation3 + $0x30] sm:$0xff]  ;;  %v1088_v3 = vld [vmem:[#allocation3 + $0x38] sm:$0xff] }
 0x137   : > { %1073 = vst.msk [vmem:[#allocation3 + $0x58] sm:$0xff] %vm328_vm0, %v1056_v62  ;;  %1179 = vperm.xlu0 %2236, %v1145_v0   ;;  %1072 = vst.msk [vmem:[#allocation3 + $0x50] sm:$0xff] %vm328_vm0, %v1055_v63  ;;  %vm1103_vm9 = vcmp.gt.f32.partialorder %v1087_v8, 0.0  ;;  %vm1104_vm11 = vcmp.gt.f32.partialorder %v1088_v3, 0.0 }
 0x138   : > { %v1038_v11 = vpop.xlane.xlu1 %1037  ;;  %v1035_v12 = vpop.xlane.xlu0 %1034 }
 0x139   : > { %v2281_v15 = vpop.eup %2280  ;;  %v1058_v16 = vadd.f32 %v1038_v11, %v962_v4  ;;  %v1057_v18 = vadd.f32 %v1035_v12, %v961_v5 }
 0x13a   : > { %v1146_v19 = vsel %vm1098_vm2, %v2281_v15, 0.0  ;;  %v1090_v22 = vld [vmem:[#allocation3 + $0x48] sm:$0xff]  ;;  %v2283_v24 = vpop.eup %2282  ;;  %v1089_v34 = vld [vmem:[#allocation3 + $0x40] sm:$0xff] }
 0x13b   : > { %1075 = vst.msk [vmem:[#allocation3 + $0x68] sm:$0xff] %vm328_vm0, %v1058_v16  ;;  %1184 = vperm.xlu1 %2237, %v1146_v19   ;;  %1074 = vst.msk [vmem:[#allocation3 + $0x60] sm:$0xff] %vm328_vm0, %v1057_v18  ;;  %2288 = vrcp.f32 %v1090_v22  ;;  %v1147_v30 = vsel %vm1099_vm3, %v2283_v24, 0.0  ;;  %v2285_v31 = vpop.eup %2284  ;;  %vm1106_vm5 = vcmp.gt.f32.partialorder %v1090_v22, 0.0  ;;  %vm1105_vm13 = vcmp.gt.f32.partialorder %v1089_v34, 0.0 }
 0x13c   : > { %v1044_v25 = vpop.xlane.xlu1 %1043  ;;  %v1041_v26 = vpop.xlane.xlu0 %1040  ;;  %2290 = vrcp.f32 %v1086_v23  ;;  %v1148_v32 = vsel %vm1100_vm4, %v2285_v31, 0.0 }
 0x13d   : > { %v1060_v28 = vadd.f32 %v1044_v25, %v964_v17  ;;  %v1059_v29 = vadd.f32 %v1041_v26, %v963_v21  ;;  %v2287_v9 = vpop.eup %2286 }
 0x13e   : > { %v1092_v2 = vld [vmem:[#allocation3 + $0x58] sm:$0xff]  ;;  %v1149_v20 = vsel %vm1101_vm6, %v2287_v9, 0.0  ;;  %v1091_v39 = vld [vmem:[#allocation3 + $0x50] sm:$0xff] }
 0x13f   : > { %1077 = vst.msk [vmem:[#allocation3 + $0x78] sm:$0xff] %vm328_vm0, %v1060_v28  ;;  %1189 = vperm.xlu1 %2237, %v1147_v30   ;;  %1076 = vst.msk [vmem:[#allocation3 + $0x70] sm:$0xff] %vm328_vm0, %v1059_v29  ;;  %2292 = vrcp.f32 %v1092_v2  ;;  %vm1108_vm8 = vcmp.gt.f32.partialorder %v1092_v2, 0.0  ;;  %vm1107_vm14 = vcmp.gt.f32.partialorder %v1091_v39, 0.0 }
 0x140   : > { %2294 = vrcp.f32 %v1087_v8 }
 0x142   : > { %v1094_v1 = vld [vmem:[#allocation3 + $0x68] sm:$0xff]  ;;  %v1093_v44 = vld [vmem:[#allocation3 + $0x60] sm:$0xff] }
 0x143   : > { %1194 = vperm.xlu1 %2237, %v1148_v32   ;;  %2296 = vrcp.f32 %v1094_v1  ;;  %vm1110_vm10 = vcmp.gt.f32.partialorder %v1094_v1, 0.0  ;;  %vm1109_vm15 = vcmp.gt.f32.partialorder %v1093_v44, 0.0 }
 0x144   : > { %2298 = vrcp.f32 %v1088_v3 }
 0x145   : > { %v2289_v14 = vpop.eup %2288 }
 0x146   : > { %v1154_v27 = vsel %vm1106_vm5, %v2289_v14, 0.0  ;;  %v1096_v33 = vld [vmem:[#allocation3 + $0x78] sm:$0xff]  ;;  %v2291_v35 = vpop.eup %2290  ;;  %v1095_v49 = vld [vmem:[#allocation3 + $0x70] sm:$0xff] }
 0x147   : > { %1199 = vperm.xlu1 %2237, %v1149_v20   ;;  %1224 = vperm.xlu0 %2236, %v1154_v27   ;;  %2300 = vrcp.f32 %v1096_v33  ;;  %v1150_v37 = vsel %vm1102_vm7, %v2291_v35, 0.0  ;;  %vm1112_vm12 = vcmp.gt.f32.partialorder %v1096_v33, 0.0  ;;  %vm1111_vm0 = vcmp.gt.f32.partialorder %v1095_v49, 0.0 }
 0x148   : > { %2302 = vrcp.f32 %v1089_v34 }
 0x149   : > { %v2293_v36 = vpop.eup %2292  ;;  %2304 = vrcp.f32 %v1091_v39 }
 0x14a   : > { %v1156_v38 = vsel %vm1108_vm8, %v2293_v36, 0.0  ;;  %v2295_v40 = vpop.eup %2294  ;;  %2306 = vrcp.f32 %v1093_v44 }
 0x14b   : > { %1204 = vperm.xlu1 %2237, %v1150_v37   ;;  %1234 = vperm.xlu0 %2236, %v1156_v38   ;;  %v1151_v42 = vsel %vm1103_vm9, %v2295_v40, 0.0  ;;  %2308 = vrcp.f32 %v1095_v49 }
 0x14d   : > { %v2297_v41 = vpop.eup %2296 }
 0x14e   : > { %v1158_v43 = vsel %vm1110_vm10, %v2297_v41, 0.0  ;;  %v2299_v45 = vpop.eup %2298 }
 0x14f   : > { %1209 = vperm.xlu1 %2237, %v1151_v42   ;;  %1244 = vperm.xlu0 %2236, %v1158_v43   ;;  %v1152_v47 = vsel %vm1104_vm11, %v2299_v45, 0.0 }
 0x151   : > { %v2301_v46 = vpop.eup %2300 }
 0x152   : > { %v1160_v48 = vsel %vm1112_vm12, %v2301_v46, 0.0  ;;  %v2303_v50 = vpop.eup %2302 }
 0x153   : > { %1214 = vperm.xlu1 %2237, %v1152_v47   ;;  %1254 = vperm.xlu0 %2236, %v1160_v48   ;;  %v1153_v51 = vsel %vm1105_vm13, %v2303_v50, 0.0  ;;  %v2305_v52 = vpop.eup %2304 }
 0x154   : > { %v1155_v53 = vsel %vm1107_vm14, %v2305_v52, 0.0  ;;  %v2307_v54 = vpop.eup %2306 }
 0x155   : > { %v1157_v55 = vsel %vm1109_vm15, %v2307_v54, 0.0  ;;  %v2309_v56 = vpop.eup %2308 }
 0x156   : > { %v1159_v57 = vsel %vm1111_vm0, %v2309_v56, 0.0 }
 0x157   : > { %1219 = vperm.xlu1 %2237, %v1153_v51  }
 0x15b   : > { %1229 = vperm.xlu1 %2237, %v1155_v53  }
 0x15f   : > { %1239 = vperm.xlu1 %2237, %v1157_v55  }
 0x163   : > { %1249 = vperm.xlu1 %2237, %v1159_v57  }
 0x186   : > { %v1887_v58 = vpop.f32.mrb[0].mxu1 }
 0x187   : > { %v1888_v59 = vpop.f32.mrb[1].mxu1 }
 0x188   : > { %v1889_v60 = vadd.f32 %v1888_v59, %v1887_v58  ;;  %v1890_v61 = vpop.f32.mrb[2].mxu1 }
 0x189   : > { %v1891_v62 = vpop.f32.mrb[3].mxu1 }
 0x18a   : > { %v1892_v63 = vadd.f32 %v1891_v62, %v1890_v61 }
 0x18e   : > { %v1893_v0 = vpop.f32.mrb[4].mxu1 }
 0x18f   : > { %v1894_v4 = vpop.f32.mrb[5].mxu1 }
 0x190   : > { %v1895_v5 = vadd.f32 %v1894_v4, %v1893_v0  ;;  %v1896_v6 = vpop.f32.mrb[6].mxu1 }
 0x191   : > { %v1897_v7 = vpop.f32.mrb[7].mxu1 }
 0x192   : > { %v1898_v10 = vadd.f32 %v1897_v7, %v1896_v6 }
 0x196   : > { %v1899_v11 = vpop.f32.mrb[8].mxu1 }
 0x197   : > { %v1900_v12 = vpop.f32.mrb[9].mxu1 }
 0x198   : > { %v1901_v13 = vadd.f32 %v1900_v12, %v1899_v11  ;;  %v1902_v15 = vpop.f32.mrb[10].mxu1 }
 0x199   : > { %v1903_v16 = vpop.f32.mrb[11].mxu1 }
 0x19a   : > { %v1904_v17 = vadd.f32 %v1903_v16, %v1902_v15 }
 0x19e   : > { %v1905_v18 = vpop.f32.mrb[12].mxu1 }
 0x19f   : > { %v1906_v19 = vpop.f32.mrb[13].mxu1 }
 0x1a0   : > { %v1907_v21 = vadd.f32 %v1906_v19, %v1905_v18  ;;  %v1908_v22 = vpop.f32.mrb[14].mxu1 }
 0x1a1   : > { %v1909_v23 = vpop.f32.mrb[15].mxu1 }
 0x1a2   : > { %v1910_v24 = vadd.f32 %v1909_v23, %v1908_v22 }
 0x1a6   : > { %v1911_v25 = vpop.f32.mrb[16].mxu1 }
 0x1a7   : > { %v1912_v26 = vpop.f32.mrb[17].mxu1 }
 0x1a8   : > { %v1913_v28 = vadd.f32 %v1912_v26, %v1911_v25  ;;  %v1914_v29 = vpop.f32.mrb[18].mxu1 }
 0x1a9   : > { %v1915_v30 = vpop.f32.mrb[19].mxu1 }
 0x1aa   : > { %v1916_v2 = vadd.f32 %v1915_v30, %v1914_v29 }
 0x1ae   : > { %v1917_v8 = vpop.f32.mrb[20].mxu1 }
 0x1af   : > { %v1918_v31 = vpop.f32.mrb[21].mxu1 }
 0x1b0   : > { %v1919_v32 = vadd.f32 %v1918_v31, %v1917_v8  ;;  %v1920_v1 = vpop.f32.mrb[22].mxu1 }
 0x1b1   : > { %v1921_v3 = vpop.f32.mrb[23].mxu1 }
 0x1b2   : > { %v1922_v9 = vadd.f32 %v1921_v3, %v1920_v1  ;;  %v2960_v1 = vld [vmem:[%s3052_s4] ss:$0 sm:$0xff] }
 0x1b6   : > { %v1180_v14 = vpop.permute.xlu0 %1179  ;;  %v1923_v27 = vpop.f32.mrb[24].mxu1 }
 0x1b7   : > { %v1257_v20 = vmul.f32 %v1889_v60, %v1180_v14  ;;  %v1924_v33 = vpop.f32.mrb[25].mxu1 }
 0x1b8   : > { %v1925_v34 = vadd.f32 %v1924_v33, %v1923_v27  ;;  %v1926_v35 = vpop.f32.mrb[26].mxu1 }
 0x1b9   : > { %2047 = vmatprep.mubr.f32.mxu0 %v1257_v20  ;;  %v1927_v37 = vpop.f32.mrb[27].mxu1 }
 0x1ba   : > { %v1185_v36 = vpop.permute.xlu1 %1184  ;;  %v1928_v39 = vadd.f32 %v1927_v37, %v1926_v35 }
 0x1bb   : > { %v1258_v38 = vmul.f32 %v1892_v63, %v1185_v36  ;;  %v2001_v63 = vpop.f32.mrb[0].mxu0 }
 0x1bc   : > { %v496_v4 = vpop.f32.mrb[1].mxu0 }
 0x1bd   : > { %2048 = vmatmul.mubr.f32.vlgmr.msra.gmra.mrb[16].mxu0 %v1258_v38  ;;  %v2002_v7 = vpop.f32.mrb[2].mxu0 }
 0x1be   : > { %v1190_v40 = vpop.permute.xlu1 %1189  ;;  %v1929_v42 = vpop.f32.mrb[28].mxu1 }
 0x1bf   : > { %v1259_v41 = vmul.f32 %v1895_v5, %v1190_v40  ;;  %v1930_v43 = vpop.f32.mrb[29].mxu1  ;;  %v499_v11 = vpop.f32.mrb[3].mxu0 }
 0x1c0   : > { %v1931_v44 = vadd.f32 %v1930_v43, %v1929_v42  ;;  %v1932_v45 = vpop.f32.mrb[30].mxu1 }
 0x1c1   : > { %2050 = vmatprep.mubr.f32.mxu0 %v1259_v41  ;;  %v1933_v47 = vpop.f32.mrb[31].mxu1 }
 0x1c2   : > { %v1195_v46 = vpop.permute.xlu1 %1194  ;;  %v1934_v49 = vadd.f32 %v1933_v47, %v1932_v45 }
 0x1c3   : > { %v1260_v48 = vmul.f32 %v1898_v10, %v1195_v46 }
 0x1c5   : > { %2051 = vmatmul.mubr.f32.gmra.mrb[18].mxu0 %v1260_v48 }
 0x1c6   : > { %v1200_v50 = vpop.permute.xlu1 %1199  ;;  %v1225_v55 = vpop.permute.xlu0 %1224 }
 0x1c7   : > { %v1261_v51 = vmul.f32 %v1901_v13, %v1200_v50  ;;  %v1266_v62 = vmul.f32 %v1916_v2, %v1225_v55 }
 0x1c9   : > { %2053 = vmatprep.mubr.f32.mxu0 %v1261_v51 }
 0x1ca   : > { %v1205_v52 = vpop.permute.xlu1 %1204  ;;  %v1235_v59 = vpop.permute.xlu0 %1234 }
 0x1cb   : > { %v1262_v53 = vmul.f32 %v1904_v17, %v1205_v52  ;;  %v1268_v10 = vmul.f32 %v1922_v9, %v1235_v59  ;;  %v2005_v17 = vpop.f32.mrb[4].mxu0 }
 0x1cc   : > { %v512_v19 = vpop.f32.mrb[5].mxu0 }
 0x1cd   : > { %2054 = vmatmul.mubr.f32.gmra.mrb[20].mxu0 %v1262_v53  ;;  %v2006_v22 = vpop.f32.mrb[6].mxu0 }
 0x1ce   : > { %v1210_v54 = vpop.permute.xlu1 %1209  ;;  %v1245_v5 = vpop.permute.xlu0 %1244 }
 0x1cf   : > { %v1263_v56 = vmul.f32 %v1907_v21, %v1210_v54  ;;  %v1270_v15 = vmul.f32 %v1928_v39, %v1245_v5 }
 0x1d1   : > { %2056 = vmatprep.mubr.f32.mxu0 %v1263_v56 }
 0x1d2   : > { %v1215_v57 = vpop.permute.xlu1 %1214  ;;  %v1255_v16 = vpop.permute.xlu0 %1254 }
 0x1d3   : > { %v1264_v58 = vmul.f32 %v1910_v24, %v1215_v57  ;;  %v1272_v23 = vmul.f32 %v1934_v49, %v1255_v16  ;;  %v515_v24 = vpop.f32.mrb[7].mxu0 }
 0x1d4   : > { %v2009_v25 = vpop.f32.mrb[8].mxu0 }
 0x1d5   : > { %2057 = vmatmul.mubr.f32.gmra.mrb[22].mxu0 %v1264_v58  ;;  %v528_v26 = vpop.f32.mrb[9].mxu0 }
 0x1d6   : > { %v1220_v60 = vpop.permute.xlu1 %1219 }
 0x1d7   : > { %v1265_v61 = vmul.f32 %v1913_v28, %v1220_v60  ;;  %v2010_v28 = vpop.f32.mrb[10].mxu0 }
 0x1d8   : > { %v531_v29 = vpop.f32.mrb[11].mxu0 }
 0x1d9   : > { %2059 = vmatprep.mubr.f32.mxu0 %v1265_v61  ;;  %v2951_v30 = vpop.f32.mrb[12].mxu0 }
 0x1da   : > { %v1230_v0 = vpop.permute.xlu1 %1229  ;;  %2060 = vmatmul.mubr.f32.gmra.mrb[24].mxu0 %v1266_v62  ;;  %v2953_v2 = vpop.f32.mrb[13].mxu0 }
 0x1db   : > { %v1267_v6 = vmul.f32 %v1919_v32, %v1230_v0  ;;  %v2955_v8 = vpop.f32.mrb[14].mxu0 }
 0x1dc   : > { %v547_v31 = vpop.f32.mrb[15].mxu0 }
 0x1dd   : > { %2062 = vmatprep.mubr.f32.mxu0 %v1267_v6 }
 0x1de   : > { %v1240_v12 = vpop.permute.xlu1 %1239  ;;  %2063 = vmatmul.mubr.f32.gmra.mrb[26].mxu0 %v1268_v10 }
 0x1df   : > { %v1269_v13 = vmul.f32 %v1925_v34, %v1240_v12 }
 0x1e1   : > { %2065 = vmatprep.mubr.f32.mxu0 %v1269_v13 }
 0x1e2   : > { %v1250_v18 = vpop.permute.xlu1 %1249  ;;  %2066 = vmatmul.mubr.f32.gmra.mrb[28].mxu0 %v1270_v15 }
 0x1e3   : > { %v1271_v21 = vmul.f32 %v1931_v44, %v1250_v18 }
 0x1e5   : > { %2068 = vmatprep.mubr.f32.mxu0 %v1271_v21 }
 0x1e6   : > { %2069 = vmatmul.mubr.f32.gmra.mrb[30].mxu0 %v1272_v23 }
 0x290   : > { %v2049_v32 = vpop.f32.mrb[16].mxu0 }
 0x291   : > { %v1377_v3 = vadd.f32 %v2049_v32, %v499_v11  ;;  %v1371_v9 = vpop.f32.mrb[17].mxu0 }
 0x292   : > { %v1372_v14 = vadd.f32 %v1371_v9, %v496_v4 }
 0x293   : > { %v1458_v20 = vadd.f32 %v2960_v1, %v1377_v3 }
 0x294   : > { %v1457_v27 = vadd.f32 %v2960_v1, %v1372_v14 }
 0x295   : > { %v1474_v33 = vmax.f32 %v1458_v20, 0.0 }
 0x296   : > { %v1473_v34 = vmax.f32 %v1457_v27, 0.0 }
 0x298   : > { %v1803_v35 = vpack.c.bf16 %v1474_v33, %v1473_v34  ;;  %v2052_v36 = vpop.f32.mrb[18].mxu0 }
 0x299   : > { %v1387_v37 = vadd.f32 %v2052_v36, %v2002_v7  ;;  %v1381_v38 = vpop.f32.mrb[19].mxu0 }
 0x29a   : > { %1804 = vst [vmem:[%s2965_s9] sm:$0xff] %v1803_v35   ;;  %v1382_v39 = vadd.f32 %v2001_v63, %v1381_v38 }
 0x29b   : > { %v1460_v40 = vadd.f32 %v2960_v1, %v1387_v37 }
 0x29c   : > { %v1459_v41 = vadd.f32 %v2960_v1, %v1382_v39 }
 0x29d   : > { %v1476_v42 = vmax.f32 %v1460_v40, 0.0 }
 0x29e   : > { %v1475_v43 = vmax.f32 %v1459_v41, 0.0 }
 0x2a0   : > { %v1808_v44 = vpack.c.bf16 %v1476_v42, %v1475_v43  ;;  %v2055_v45 = vpop.f32.mrb[20].mxu0 }
 0x2a1   : > { %v1397_v46 = vadd.f32 %v2055_v45, %v515_v24  ;;  %v1391_v47 = vpop.f32.mrb[21].mxu0 }
 0x2a2   : > { %1840 = vst [vmem:[%s2965_s9 + $0x8] sm:$0xff] %v1808_v44   ;;  %v1392_v48 = vadd.f32 %v1391_v47, %v512_v19 }
 0x2a3   : > { %v1462_v49 = vadd.f32 %v2960_v1, %v1397_v46 }
 0x2a4   : > { %v1461_v50 = vadd.f32 %v2960_v1, %v1392_v48 }
 0x2a5   : > { %v1478_v51 = vmax.f32 %v1462_v49, 0.0 }
 0x2a6   : > { %v1477_v52 = vmax.f32 %v1461_v50, 0.0 }
 0x2a8   : > { %v1813_v53 = vpack.c.bf16 %v1478_v51, %v1477_v52  ;;  %v2058_v54 = vpop.f32.mrb[22].mxu0 }
 0x2a9   : > { %v1407_v55 = vadd.f32 %v2058_v54, %v2006_v22  ;;  %v1401_v56 = vpop.f32.mrb[23].mxu0 }
 0x2aa   : > { %1841 = vst [vmem:[%s2965_s9 + $0x10] sm:$0xff] %v1813_v53   ;;  %v1402_v57 = vadd.f32 %v2005_v17, %v1401_v56 }
 0x2ab   : > { %v1464_v58 = vadd.f32 %v2960_v1, %v1407_v55 }
 0x2ac   : > { %v1463_v59 = vadd.f32 %v2960_v1, %v1402_v57 }
 0x2ad   : > { %v1480_v60 = vmax.f32 %v1464_v58, 0.0  ;;  %v2061_v61 = vpop.f32.mrb[24].mxu0 }
 0x2ae   : > { %v1479_v62 = vmax.f32 %v1463_v59, 0.0  ;;  %v1417_v63 = vadd.f32 %v2061_v61, %v531_v29  ;;  %v1411_v0 = vpop.f32.mrb[25].mxu0 }
 0x2af   : > { %v1412_v4 = vadd.f32 %v1411_v0, %v528_v26 }
 0x2b0   : > { %v1818_v5 = vpack.c.bf16 %v1480_v60, %v1479_v62  ;;  %v1466_v6 = vadd.f32 %v2960_v1, %v1417_v63 }
 0x2b1   : > { %v1465_v7 = vadd.f32 %v2960_v1, %v1412_v4  ;;  %v2064_v10 = vpop.f32.mrb[26].mxu0 }
 0x2b2   : > { %1842 = vst [vmem:[%s2965_s9 + $0x18] sm:$0xff] %v1818_v5   ;;  %v1482_v11 = vmax.f32 %v1466_v6, 0.0  ;;  %v1427_v12 = vadd.f32 %v2064_v10, %v2010_v28  ;;  %v1421_v13 = vpop.f32.mrb[27].mxu0 }
 0x2b3   : > { %v1481_v15 = vmax.f32 %v1465_v7, 0.0  ;;  %v1422_v16 = vadd.f32 %v2009_v25, %v1421_v13 }
 0x2b4   : > { %v1468_v17 = vadd.f32 %v2960_v1, %v1427_v12 }
 0x2b5   : > { %v1823_v18 = vpack.c.bf16 %v1482_v11, %v1481_v15  ;;  %v1467_v19 = vadd.f32 %v2960_v1, %v1422_v16  ;;  %v2067_v21 = vpop.f32.mrb[28].mxu0 }
 0x2b6   : > { %v1484_v22 = vmax.f32 %v1468_v17, 0.0  ;;  %v1437_v23 = vadd.f32 %v2067_v21, %v547_v31  ;;  %v1431_v24 = vpop.f32.mrb[29].mxu0 }
 0x2b7   : > { %1843 = vst [vmem:[%s2965_s9 + $0x20] sm:$0xff] %v1823_v18   ;;  %v1483_v26 = vmax.f32 %v1467_v19, 0.0  ;;  %v1432_v29 = vadd.f32 %v1431_v24, %v2953_v2 }
 0x2b8   : > { %v1470_v28 = vadd.f32 %v2960_v1, %v1437_v23 }
 0x2b9   : > { %v1828_v25 = vpack.c.bf16 %v1484_v22, %v1483_v26  ;;  %v1469_v32 = vadd.f32 %v2960_v1, %v1432_v29  ;;  %v2070_v3 = vpop.f32.mrb[30].mxu0 }
 0x2ba   : > { %v1486_v9 = vmax.f32 %v1470_v28, 0.0  ;;  %v1447_v14 = vadd.f32 %v2070_v3, %v2955_v8  ;;  %v1441_v20 = vpop.f32.mrb[31].mxu0 }
 0x2bb   : > { %1844 = vst [vmem:[%s2965_s9 + $0x28] sm:$0xff] %v1828_v25   ;;  %v1485_v31 = vmax.f32 %v1469_v32, 0.0  ;;  %v1442_v27 = vadd.f32 %v2951_v30, %v1441_v20 }
 0x2bc   : > { %v1472_v2 = vadd.f32 %v2960_v1, %v1447_v14 }
 0x2bd   : > { %v1833_v33 = vpack.c.bf16 %v1486_v9, %v1485_v31  ;;  %v1471_v34 = vadd.f32 %v2960_v1, %v1442_v27 }
 0x2be   : > { %v1488_v35 = vmax.f32 %v1472_v2, 0.0 }
 0x2bf   : > { %1845 = vst [vmem:[%s2965_s9 + $0x30] sm:$0xff] %v1833_v33   ;;  %v1487_v36 = vmax.f32 %v1471_v34, 0.0 }
 0x2c1   : > { %v1838_v30 = vpack.c.bf16 %v1488_v35, %v1487_v36 }
 0x2c3   : > { %1846 = vst [vmem:[%s2965_s9 + $0x38] sm:$0xff] %v1838_v30  }
 0x2c4   : > { %2437 = shalt.err (!%p2434_p0)
}
 0x2c5   : > { %s2438_s28 = scalar_lea.hbm %s2996_s24, 1024  ;;  %s2442_s29 = scalar_lea.hbm %s3053_s5, 2048 }
 0x2c6   : > { %p2439_p4 = scmp.ne.s32.totalorder %s2996_s24, %s2438_s28  ;;  %p2443_p12 = scmp.lt.u32.totalorder %s2996_s24, %s3053_s5 }
 0x2c7   : > { %p2444_p1 = scmp.lt.u32.totalorder %s2442_s29, %s2438_s28  ;;  %p2446_p13 = scmp.lt.u32.totalorder %s2438_s28, %s2996_s24 }
 0x2c8   : > { %p2440_p2 = pnand %p2439_p4, %p2719_p3 }
 0x2c9   : > { %p2445_p7 = por %p2444_p1, %p2443_p12 }
 0x2ca   : > { %p2441_p8 = pneg %p2440_p2 }
 0x2cb   : > { %p2447_p6 = por %p2446_p13, %p2445_p7 }
 0x2cd   : > { %p2448_p10 = pnand %p2447_p6, %p2441_p8 }
 0x2cf   : > { %2451 = shalt.err (!%p2448_p10)
}
 0x2d0   : > { %s2527_s9 = smov 64   ;;  %s2528_s8 = smov 4  }
 0x2d1   : > { %2149 = dma.vmem_to_hbm [thread:$0]  (%p2719_p3), %s2998_s13, 1024, %s2996_s24, %s1570_s11, %s2527_s9, %s2527_s9, %s2528_s8  }
 0x2d2 PF: > { %s3076_s27 = sld [smem:[#allocation18_spill]]  ;;  %s1598_s15 = sand.u32 1, %s2494_s18  }
 0x2d3   : > { %p3078_p5 = scmp.ge.s32.totalorder %s2514_s23, 2  ;;  %s1599_s25 = scalar_lea.sflag [#allocation7], %s1598_s15 }
 0x2d8   : > { %p3077_p11 = scmp.ne.s32.totalorder %s3076_s27, 0 }
 0x2da   : > { %p2166_p9 = pnand %p3078_p5, %p3077_p11 }
 0x2dc   : > { %2489 = dma.done.wait (!%p2166_p9), %s1599_s25, 1024  }
 0x2dd   : > { %2491 = vsyncadd (!%p2166_p9), %s1599_s25, 4294966272  ;;  %s23_s23 = sadd.s32 1, %s2514_s23   ;;  %s3079_s18 = smov %s2498_s19 }
 0x2de   : > { %p20_p0 = scmp.ge.s32.totalorder %s23_s23, 4   ;;  %s3080_s19 = smov %s2502_s20 }
 0x2df   : > { %s3081_s20 = smov %s2728_s17  ;;  %s3082_s21 = smov %s2510_s22 }
 0x2e0   : > { %s3083_s22 = smov %s3085_s16  ;;  %22 = sbr.rel (!%p20_p0) target bundleno = 10 (0xa), region = 107 }
 0x2e7   :  { %1604 = vsyncpa [#allocation6], 1 }
 0x2e8   :  { %1606 = vsyncpa [#allocation6 + $0x1], 1 }
 0x2e9   :  { %1607 = vsyncpa [#allocation9], 1 }
 0x2ea   :  { %1608 = vsyncpa [#allocation12], 1 }
 0x2eb   :  { %1609 = vsyncpa [#allocation7], 1 }
 0x2ec   :  { %1611 = vsyncpa [#allocation7 + $0x1], 1 }

</bundles_post_ra>
